<compile_context>
chip_gen: v7x
topology: tpu7x:2x2x1
jax: 0.10.0
libtpu: 0.0.40
codegen_flags: <defaults>
</compile_context>

<pallas_src>
import jax
import jax.numpy as jnp
from jax.experimental import pallas as pl
from jax.experimental.pallas import tpu as pltpu

_HI = jax.lax.Precision.HIGHEST


# ------------------------------- kernel ------------------------------------ #

def _elu(x):
    # F.elu, alpha=1. The where discards the positive-branch exp, so no clamp needed.
    return jnp.where(x > 0, x, jnp.exp(x) - 1.0)


def _edge_masks(L, dtype):
    lane = jax.lax.broadcasted_iota(jnp.int32, (1, L), 1)
    return (lane > 0).astype(dtype), (lane < L - 1).astype(dtype)


def _res_block(x, s1, b1, c3b, sh2, sh3, w1, w2cat, w3, not_first, not_last):
    """ResidualBlock(C, C); BN (inference) and conv biases folded host-side.

    s1 / b1  : bn1 per-channel affine                           (C, 1)  f32
    c3b      : conv3 bias                                        (C, 1)  f32
    sh2 / sh3: folded bn2/bn3 shifts (conv1/conv2 bias included) (C4, 1) f32
    w1       : diag(bn2_scale) @ conv1.W                         (C4, C)    bf16
    w2cat    : diag(bn3_scale) @ [W2_t0 | W2_t1 | W2_t2]         (C4, 3*C4) bf16
    w3       : conv3.W                                           (C, C4)    bf16
    """
    h1 = _elu(x * s1 + b1)                                                     # elu(bn1(x))
    h2 = _elu(jnp.dot(w1, h1.astype(w1.dtype),
                      preferred_element_type=jnp.float32) + sh2)               # elu(bn2(conv1))

    L = h2.shape[1]
    # k=3 conv as ONE matmul against [h2[l-1]; h2[l]; h2[l+1]] (zero-padded edges).
    h2_m1 = pltpu.roll(h2, shift=1, axis=1) * not_first        # h2[l-1]
    h2_p1 = pltpu.roll(h2, shift=L - 1, axis=1) * not_last     # h2[l+1]
    h2cat = jnp.concatenate([h2_m1, h2, h2_p1], axis=0)        # (3*C4, L)

    h3 = _elu(jnp.dot(w2cat, h2cat.astype(w2cat.dtype),
                      preferred_element_type=jnp.float32) + sh3)               # elu(bn3(conv2))
    y = jnp.dot(w3, h3.astype(w3.dtype),
                preferred_element_type=jnp.float32) + c3b                      # conv3
    return y + x                                                               # identity shortcut


def attention_block_kernel(x_ref, slab_ref, w1_ref, w2_ref, w3_ref,
                           wm_ref, pool_ref, up_ref, o_ref):
    x = x_ref[0]                          # (C, L) one batch slab, f32
    C, L = x.shape
    Lh = L // 2
    C4 = C // 4

    slab = slab_ref[...]                  # (C, 16) packed per-channel vectors, f32
    nf_L, nl_L = _edge_masks(L, x.dtype)
    nf_h, nl_h = _edge_masks(Lh, x.dtype)

    def res(i, h, nf, nl):
        return _res_block(
            h,
            slab[:, 3 * i + 0:3 * i + 1],       # bn1 scale
            slab[:, 3 * i + 1:3 * i + 2],       # bn1 shift
            slab[:, 3 * i + 2:3 * i + 3],       # conv3 bias
            slab[:C4, 10 + 2 * i:11 + 2 * i],   # folded bn2 shift
            slab[:C4, 11 + 2 * i:12 + 2 * i],   # folded bn3 shift
            w1_ref[i], w2_ref[i], w3_ref[i],
            nf, nl)

    # ---- trunk branch: two residual blocks -------------------------------- #
    t = res(0, x, nf_L, nl_L)
    t = res(1, t, nf_L, nl_L)

    # ---- encoder: MaxPool1d(2,2) then residual block ----------------------- #
    # pooled[:, i] = max(x[:, 2i], x[:, 2i+1]) = max(x, shift_left(x))[:, 2i];
    # 0/1 even-column selector matmul kept in f32 so pooling stays exact.
    m = jnp.maximum(x, pltpu.roll(x, shift=L - 1, axis=1))
    pooled = jnp.dot(m, pool_ref[...], preferred_element_type=jnp.float32)    # (C, Lh)
    enc = res(2, pooled, nf_h, nl_h)

    # ---- mask head: conv1x1 -> conv1x1 -> sigmoid (folded into one conv) --- #
    wm = wm_ref[...]
    bm = slab[:, 9:10]
    mask_h = jax.nn.sigmoid(
        jnp.dot(wm, enc.astype(wm.dtype), preferred_element_type=jnp.float32) + bm)
    # linear (align_corners=False) upsample Lh -> L via constant matmul
    up = up_ref[...]
    mask = jnp.dot(mask_h.astype(up.dtype), up, preferred_element_type=jnp.float32)

    # ---- output = (1 + mask) * trunk --------------------------------------- #
    o_ref[0] = ((1.0 + mask) * t).astype(o_ref.dtype)


# ------------------------------- wrapper ------------------------------------ #

def attention_block(x, slab, w1_all, w2_all, w3_all, wm, pool_sel, up_mat):
    B, C, L = x.shape
    # Keep L and L//2 on 128-lane tile boundaries so every matmul stays lane-aligned.
    assert C % 4 == 0 and L % 256 == 0, (C, L)

    params = [slab, w1_all, w2_all, w3_all, wm, pool_sel, up_mat]

    def whole(p):
        return pl.BlockSpec(p.shape, (lambda b, n=p.ndim: (0,) * n))

    return pl.pallas_call(
        attention_block_kernel,
        out_shape=jax.ShapeDtypeStruct((B, C, L), x.dtype),
        grid=(B,),
        in_specs=[pl.BlockSpec((1, C, L), lambda b: (b, 0, 0))] + [whole(p) for p in params],
        out_specs=pl.BlockSpec((1, C, L), lambda b: (b, 0, 0)),
        compiler_params=pltpu.CompilerParams(dimension_semantics=("parallel",)),
    )(x, *params)


# ----------------------- host-side parameter folding ------------------------ #

def _raw_bn(key, ch):
    k1, k2, k3, k4 = jax.random.split(key, 4)
    gamma = 1.0 + 0.1 * jax.random.normal(k1, (ch,), dtype=jnp.float32)
    beta = 0.1 * jax.random.normal(k2, (ch,), dtype=jnp.float32)
    mean = 0.1 * jax.random.normal(k3, (ch,), dtype=jnp.float32)
    var = 1.0 + 0.1 * jnp.abs(jax.random.normal(k4, (ch,), dtype=jnp.float32))
    return gamma, beta, mean, var


def make_residual_raw(key, C):
    C4 = C // 4
    ks = jax.random.split(key, 9)
    return dict(
        bn1=_raw_bn(ks[0], C), bn2=_raw_bn(ks[1], C4), bn3=_raw_bn(ks[2], C4),
        w1=0.1 * jax.random.normal(ks[3], (C4, C), dtype=jnp.float32),
        b1=0.05 * jax.random.normal(ks[4], (C4,), dtype=jnp.float32),
        w2=0.1 * jax.random.normal(ks[5], (C4, C4, 3), dtype=jnp.float32),   # (out, in, k)
        b2=0.05 * jax.random.normal(ks[6], (C4,), dtype=jnp.float32),
        w3=0.1 * jax.random.normal(ks[7], (C, C4), dtype=jnp.float32),
        b3=0.05 * jax.random.normal(ks[8], (C,), dtype=jnp.float32),
    )


def make_mask_raw(key, C):
    k1, k2, k3, k4 = jax.random.split(key, 4)
    return dict(
        wa=0.1 * jax.random.normal(k1, (C, C), dtype=jnp.float32),
        ba=0.05 * jax.random.normal(k2, (C,), dtype=jnp.float32),
        wb=0.1 * jax.random.normal(k3, (C, C), dtype=jnp.float32),
        bb=0.05 * jax.random.normal(k4, (C,), dtype=jnp.float32),
    )


def _bn_affine(bn):
    g, b, m, v = bn
    s = g / jnp.sqrt(v + 1e-5)
    return s, b - m * s


def fold_residual(raw):
    s1, sh1 = _bn_affine(raw["bn1"])
    s2, sh2b = _bn_affine(raw["bn2"])
    s3, sh3b = _bn_affine(raw["bn3"])
    w1p = s2[:, None] * raw["w1"]                                       # fold bn2 scale into conv1
    sh2 = s2 * raw["b1"] + sh2b                                         # fold conv1 bias into bn2
    w2p = s3[:, None, None] * raw["w2"]                                 # fold bn3 scale into conv2
    w2cat = jnp.concatenate([w2p[:, :, 0], w2p[:, :, 1], w2p[:, :, 2]], axis=1)   # (C4, 3*C4)
    sh3 = s3 * raw["b2"] + sh3b                                         # fold conv2 bias into bn3
    vC = jnp.stack([s1, sh1, raw["b3"]], axis=1).astype(jnp.float32)    # (C, 3)
    vC4 = jnp.stack([sh2, sh3], axis=1).astype(jnp.float32)             # (C4, 2)
    return dict(vC=vC, vC4=vC4, w1=w1p, w2=w2cat, w3=raw["w3"])


def fold_mask(raw):
    # conv(wb,bb)(conv(wa,ba)(x)) has no nonlinearity between -> single conv
    wm = jnp.einsum("ij,jk->ik", raw["wb"], raw["wa"], precision=_HI)
    bm = jnp.einsum("ij,j->i", raw["wb"], raw["ba"], precision=_HI) + raw["bb"]
    return dict(wm=wm, bm=bm)


def pack_params(t1, t2, e, mask):
    """Pack everything into few lane-dense slabs (fewer DMA descriptors)."""
    C = t1["vC"].shape[0]
    C4 = C // 4
    slab = jnp.zeros((C, 16), jnp.float32)
    for i, p in enumerate((t1, t2, e)):
        slab = slab.at[:, 3 * i:3 * i + 3].set(p["vC"])
        slab = slab.at[:C4, 10 + 2 * i:12 + 2 * i].set(p["vC4"])
    slab = slab.at[:, 9].set(mask["bm"])
    w1_all = jnp.stack([t1["w1"], t2["w1"], e["w1"]]).astype(jnp.bfloat16)    # (3, C4, C)
    w2_all = jnp.stack([t1["w2"], t2["w2"], e["w2"]]).astype(jnp.bfloat16)    # (3, C4, 3*C4)
    w3_all = jnp.stack([t1["w3"], t2["w3"], e["w3"]]).astype(jnp.bfloat16)    # (3, C, C4)
    wm = mask["wm"].astype(jnp.bfloat16)
    return slab, w1_all, w2_all, w3_all, wm


def make_pool_selector(L):
    # Even-column selector (L, L//2): pooled = max(x, shift_left(x)) @ S.
    l = jnp.arange(L)[:, None]
    i = jnp.arange(L // 2)[None, :]
    return (l == 2 * i).astype(jnp.float32)


def make_upsample_matrix(in_len, out_len):
    # F.interpolate(mode='linear', align_corners=False) as a constant (in_len, out_len)
    # matrix; for scale 2 the weights are 0/0.25/0.75/1.0 (exact in bf16).
    scale = in_len / out_len
    coord = jnp.maximum((jnp.arange(out_len, dtype=jnp.float32) + 0.5) * scale - 0.5, 0.0)
    idx0 = jnp.clip(jnp.floor(coord).astype(jnp.int32), 0, in_len - 1)
    idx1 = jnp.minimum(idx0 + 1, in_len - 1)
    w1 = coord - idx0.astype(jnp.float32)
    w0 = 1.0 - w1
    rows = jnp.arange(in_len)[:, None]
    return ((rows == idx0[None, :]).astype(jnp.float32) * w0[None, :]
            + (rows == idx1[None, :]).astype(jnp.float32) * w1[None, :])   # (in_len, out_len)


# --------------------------- pure-JAX reference ------------------------------ #

def _ref_bn(x, p):
    g, b, m, v = p
    return (x - m[None, :, None]) / jnp.sqrt(v + 1e-5)[None, :, None] * g[None, :, None] \
        + b[None, :, None]


def _ref_conv1x1(x, w, b):
    return jnp.einsum("oc,bcl->bol", w, x, precision=_HI) + b[None, :, None]


def _ref_conv3(x, w, b):
    L = x.shape[2]
    xp = jnp.pad(x, ((0, 0), (0, 0), (1, 1)))
    out = sum(jnp.einsum("oc,bcl->bol", w[:, :, t], xp[:, :, t:t + L], precision=_HI)
              for t in range(3))
    return out + b[None, :, None]


def _ref_elu(x):
    return jnp.where(x > 0, x, jnp.exp(jnp.minimum(x, 0.0)) - 1.0)


def _ref_residual(x, raw):
    h = _ref_elu(_ref_bn(x, raw["bn1"]))
    h = _ref_conv1x1(h, raw["w1"], raw["b1"])
    h = _ref_elu(_ref_bn(h, raw["bn2"]))
    h = _ref_conv3(h, raw["w2"], raw["b2"])
    h = _ref_elu(_ref_bn(h, raw["bn3"]))
    h = _ref_conv1x1(h, raw["w3"], raw["b3"])
    return h + x


def _ref_interp_linear(x, out_len):
    B, C, in_len = x.shape
    scale = in_len / out_len
    coord = jnp.maximum((jnp.arange(out_len, dtype=jnp.float32) + 0.5) * scale - 0.5, 0.0)
    idx0 = jnp.clip(jnp.floor(coord).astype(jnp.int32), 0, in_len - 1)
    idx1 = jnp.minimum(idx0 + 1, in_len - 1)
    w1 = coord - idx0.astype(jnp.float32)
    return x[:, :, idx0] * (1.0 - w1) + x[:, :, idx1] * w1


def reference_forward(x, raw_t1, raw_t2, raw_e, raw_m):
    B, C, L = x.shape
    trunk = _ref_residual(_ref_residual(x, raw_t1), raw_t2)
    pooled = jnp.max(x.reshape(B, C, L // 2, 2), axis=-1)
    enc = _ref_residual(pooled, raw_e)
    h = _ref_conv1x1(enc, raw_m["wa"], raw_m["ba"])
    h = _ref_conv1x1(h, raw_m["wb"], raw_m["bb"])
    mask = _ref_interp_linear(jax.nn.sigmoid(h), L)
    return (1.0 + mask) * trunk


# ---------------------------------- main ------------------------------------ #

if __name__ == "__main__":
    B, C, L = 2, 32, 256   # C divisible by 4, L a multiple of 256 (lane-aligned halves)
    key = jax.random.PRNGKey(0)
    kx, kt0, kt1, ke, ko = jax.random.split(key, 5)

    x = jax.random.normal(kx, (B, C, L), dtype=jnp.float32)
    raw_t1 = make_residual_raw(kt0, C)
    raw_t2 = make_residual_raw(kt1, C)
    raw_e = make_residual_raw(ke, C)
    raw_m = make_mask_raw(ko, C)

    slab, w1_all, w2_all, w3_all, wm = pack_params(
        fold_residual(raw_t1), fold_residual(raw_t2), fold_residual(raw_e),
        fold_mask(raw_m))
    pool_sel = make_pool_selector(L)
    up_mat = make_upsample_matrix(L // 2, L).astype(jnp.bfloat16)

    out = attention_block(x, slab, w1_all, w2_all, w3_all, wm, pool_sel, up_mat)
    out = jax.block_until_ready(out)

    ref = reference_forward(x, raw_t1, raw_t2, raw_e, raw_m)

    assert out.shape == (B, C, L), out.shape
    assert bool(jnp.all(jnp.isfinite(out)))
    # bf16 MXU operands -> slightly looser tolerance than the all-f32 variant.
    assert bool(jnp.allclose(out, ref, rtol=2e-2, atol=3e-2)), \
        float(jnp.max(jnp.abs(out - ref)))
    print("KERNEL_OK")
</pallas_src>

<mosaic_0001>
module attributes {stable_mosaic.version = 11 : i64} {
  func.func @attention_block_kernel(%arg0: i32, %arg1: memref<1x32x256xf32, #tpu.memory_space<vmem>>, %arg2: memref<32x16xf32, #tpu.memory_space<vmem>>, %arg3: memref<3x8x32xbf16, #tpu.memory_space<vmem>>, %arg4: memref<3x8x24xbf16, #tpu.memory_space<vmem>>, %arg5: memref<3x32x8xbf16, #tpu.memory_space<vmem>>, %arg6: memref<32x32xbf16, #tpu.memory_space<vmem>>, %arg7: memref<256x128xf32, #tpu.memory_space<vmem>>, %arg8: memref<128x256xbf16, #tpu.memory_space<vmem>>, %arg9: memref<1x32x256xf32, #tpu.memory_space<vmem>>) attributes {dimension_semantics = [#tpu.dimension_semantics<parallel>], iteration_bounds = array<i64: 2>, scalar_prefetch = 0 : i64, scratch_operands = 0 : i64, tpu.core_type = #tpu.core_type<tc>, window_params = [{transform_indices = @transform_0, window_bounds = array<i64: 1, 32, 256>}, {pipeline_mode = #tpu.pipeline_mode<synchronous>, transform_indices = @transform_1, window_bounds = array<i64: 32, 16>}, {pipeline_mode = #tpu.pipeline_mode<synchronous>, transform_indices = @transform_2, window_bounds = array<i64: 3, 8, 32>}, {pipeline_mode = #tpu.pipeline_mode<synchronous>, transform_indices = @transform_3, window_bounds = array<i64: 3, 8, 24>}, {pipeline_mode = #tpu.pipeline_mode<synchronous>, transform_indices = @transform_4, window_bounds = array<i64: 3, 32, 8>}, {pipeline_mode = #tpu.pipeline_mode<synchronous>, transform_indices = @transform_5, window_bounds = array<i64: 32, 32>}, {pipeline_mode = #tpu.pipeline_mode<synchronous>, transform_indices = @transform_6, window_bounds = array<i64: 256, 128>}, {pipeline_mode = #tpu.pipeline_mode<synchronous>, transform_indices = @transform_7, window_bounds = array<i64: 128, 256>}, {transform_indices = @transform_8, window_bounds = array<i64: 1, 32, 256>}]} {
    %c0 = arith.constant 0 : index
    %c0_0 = arith.constant 0 : index
    %c0_1 = arith.constant 0 : index
    %0 = vector.load %arg1[%c0, %c0_0, %c0_1] : memref<1x32x256xf32, #tpu.memory_space<vmem>>, vector<1x32x256xf32>
    %1 = vector.shape_cast %0 : vector<1x32x256xf32> to vector<32x256xf32>
    %c0_2 = arith.constant 0 : index
    %c0_3 = arith.constant 0 : index
    %2 = vector.load %arg2[%c0_2, %c0_3] : memref<32x16xf32, #tpu.memory_space<vmem>>, vector<32x16xf32>
    %3 = tpu.iota {dimensions = array<i32: 1>} : vector<1x256xi32>
    %c0_i32 = arith.constant 0 : i32
    %4 = vector.broadcast %c0_i32 : i32 to vector<1x256xi32>
    %5 = arith.cmpi sgt, %3, %4 : vector<1x256xi32>
    %6 = arith.extui %5 : vector<1x256xi1> to vector<1x256xi32>
    %7 = arith.sitofp %6 : vector<1x256xi32> to vector<1x256xf32>
    %c255_i32 = arith.constant 255 : i32
    %8 = vector.broadcast %c255_i32 : i32 to vector<1x256xi32>
    %9 = arith.cmpi slt, %3, %8 : vector<1x256xi32>
    %10 = arith.extui %9 : vector<1x256xi1> to vector<1x256xi32>
    %11 = arith.sitofp %10 : vector<1x256xi32> to vector<1x256xf32>
    %12 = tpu.iota {dimensions = array<i32: 1>} : vector<1x128xi32>
    %c0_i32_4 = arith.constant 0 : i32
    %13 = vector.broadcast %c0_i32_4 : i32 to vector<1x128xi32>
    %14 = arith.cmpi sgt, %12, %13 : vector<1x128xi32>
    %15 = arith.extui %14 : vector<1x128xi1> to vector<1x128xi32>
    %16 = arith.sitofp %15 : vector<1x128xi32> to vector<1x128xf32>
    %c127_i32 = arith.constant 127 : i32
    %17 = vector.broadcast %c127_i32 : i32 to vector<1x128xi32>
    %18 = arith.cmpi slt, %12, %17 : vector<1x128xi32>
    %19 = arith.extui %18 : vector<1x128xi1> to vector<1x128xi32>
    %20 = arith.sitofp %19 : vector<1x128xi32> to vector<1x128xf32>
    %21 = vector.extract_strided_slice %2 {offsets = [0, 0], sizes = [32, 1], strides = [1, 1]} : vector<32x16xf32> to vector<32x1xf32>
    %22 = vector.extract_strided_slice %2 {offsets = [0, 1], sizes = [32, 1], strides = [1, 1]} : vector<32x16xf32> to vector<32x1xf32>
    %23 = vector.extract_strided_slice %2 {offsets = [0, 2], sizes = [32, 1], strides = [1, 1]} : vector<32x16xf32> to vector<32x1xf32>
    %24 = vector.extract_strided_slice %2 {offsets = [0, 10], sizes = [8, 1], strides = [1, 1]} : vector<32x16xf32> to vector<8x1xf32>
    %25 = vector.extract_strided_slice %2 {offsets = [0, 11], sizes = [8, 1], strides = [1, 1]} : vector<32x16xf32> to vector<8x1xf32>
    %c0_5 = arith.constant 0 : index
    %c0_6 = arith.constant 0 : index
    %c0_7 = arith.constant 0 : index
    %26 = vector.load %arg3[%c0_5, %c0_6, %c0_7] : memref<3x8x32xbf16, #tpu.memory_space<vmem>>, vector<1x8x32xbf16>
    %27 = vector.shape_cast %26 : vector<1x8x32xbf16> to vector<8x32xbf16>
    %c0_8 = arith.constant 0 : index
    %c0_9 = arith.constant 0 : index
    %c0_10 = arith.constant 0 : index
    %28 = vector.load %arg4[%c0_8, %c0_9, %c0_10] : memref<3x8x24xbf16, #tpu.memory_space<vmem>>, vector<1x8x24xbf16>
    %29 = vector.shape_cast %28 : vector<1x8x24xbf16> to vector<8x24xbf16>
    %c0_11 = arith.constant 0 : index
    %c0_12 = arith.constant 0 : index
    %c0_13 = arith.constant 0 : index
    %30 = vector.load %arg5[%c0_11, %c0_12, %c0_13] : memref<3x32x8xbf16, #tpu.memory_space<vmem>>, vector<1x32x8xbf16>
    %31 = vector.shape_cast %30 : vector<1x32x8xbf16> to vector<32x8xbf16>
    %32 = vector.broadcast %21 : vector<32x1xf32> to vector<32x256xf32>
    %33 = arith.mulf %1, %32 : vector<32x256xf32>
    %34 = vector.broadcast %22 : vector<32x1xf32> to vector<32x256xf32>
    %35 = arith.addf %33, %34 : vector<32x256xf32>
    %cst = arith.constant 0.000000e+00 : f32
    %36 = vector.broadcast %cst : f32 to vector<32x256xf32>
    %37 = arith.cmpf ogt, %35, %36 : vector<32x256xf32>
    %38 = math.exp %35 : vector<32x256xf32>
    %cst_14 = arith.constant 1.000000e+00 : f32
    %39 = vector.broadcast %cst_14 : f32 to vector<32x256xf32>
    %40 = arith.subf %38, %39 : vector<32x256xf32>
    %41 = arith.select %37, %35, %40 : vector<32x256xi1>, vector<32x256xf32>
    %42 = arith.truncf %41 : vector<32x256xf32> to vector<32x256xbf16>
    %cst_15 = arith.constant dense<0.000000e+00> : vector<8x256xf32>
    %43 = tpu.matmul %27, %42, %cst_15 {dimension_numbers = #tpu.dot_dimension_numbers<[1], [0], [0], [1], [0, 0, 1, 1], [], []>} : vector<8x32xbf16>, vector<32x256xbf16>, vector<8x256xf32> -> vector<8x256xf32>
    %44 = vector.broadcast %24 : vector<8x1xf32> to vector<8x256xf32>
    %45 = arith.addf %43, %44 : vector<8x256xf32>
    %cst_16 = arith.constant 0.000000e+00 : f32
    %46 = vector.broadcast %cst_16 : f32 to vector<8x256xf32>
    %47 = arith.cmpf ogt, %45, %46 : vector<8x256xf32>
    %48 = math.exp %45 : vector<8x256xf32>
    %cst_17 = arith.constant 1.000000e+00 : f32
    %49 = vector.broadcast %cst_17 : f32 to vector<8x256xf32>
    %50 = arith.subf %48, %49 : vector<8x256xf32>
    %51 = arith.select %47, %45, %50 : vector<8x256xi1>, vector<8x256xf32>
    %c1_i32 = arith.constant 1 : i32
    %52 = tpu.dynamic_rotate %51 by %c1_i32 dim 1 : vector<8x256xf32>, i32 -> vector<8x256xf32>
    %53 = vector.broadcast %7 : vector<1x256xf32> to vector<8x256xf32>
    %54 = arith.mulf %52, %53 : vector<8x256xf32>
    %c255_i32_18 = arith.constant 255 : i32
    %55 = tpu.dynamic_rotate %51 by %c255_i32_18 dim 1 : vector<8x256xf32>, i32 -> vector<8x256xf32>
    %56 = vector.broadcast %11 : vector<1x256xf32> to vector<8x256xf32>
    %57 = arith.mulf %55, %56 : vector<8x256xf32>
    %58 = tpu.concatenate %54, %51, %57 in 0 : vector<8x256xf32>, vector<8x256xf32>, vector<8x256xf32> -> vector<24x256xf32>
    %59 = arith.truncf %58 : vector<24x256xf32> to vector<24x256xbf16>
    %cst_19 = arith.constant dense<0.000000e+00> : vector<8x256xf32>
    %60 = tpu.matmul %29, %59, %cst_19 {dimension_numbers = #tpu.dot_dimension_numbers<[1], [0], [0], [1], [0, 0, 1, 1], [], []>} : vector<8x24xbf16>, vector<24x256xbf16>, vector<8x256xf32> -> vector<8x256xf32>
    %61 = vector.broadcast %25 : vector<8x1xf32> to vector<8x256xf32>
    %62 = arith.addf %60, %61 : vector<8x256xf32>
    %cst_20 = arith.constant 0.000000e+00 : f32
    %63 = vector.broadcast %cst_20 : f32 to vector<8x256xf32>
    %64 = arith.cmpf ogt, %62, %63 : vector<8x256xf32>
    %65 = math.exp %62 : vector<8x256xf32>
    %cst_21 = arith.constant 1.000000e+00 : f32
    %66 = vector.broadcast %cst_21 : f32 to vector<8x256xf32>
    %67 = arith.subf %65, %66 : vector<8x256xf32>
    %68 = arith.select %64, %62, %67 : vector<8x256xi1>, vector<8x256xf32>
    %69 = arith.truncf %68 : vector<8x256xf32> to vector<8x256xbf16>
    %cst_22 = arith.constant dense<0.000000e+00> : vector<32x256xf32>
    %70 = tpu.matmul %31, %69, %cst_22 {dimension_numbers = #tpu.dot_dimension_numbers<[1], [0], [0], [1], [0, 0, 1, 1], [], []>} : vector<32x8xbf16>, vector<8x256xbf16>, vector<32x256xf32> -> vector<32x256xf32>
    %71 = vector.broadcast %23 : vector<32x1xf32> to vector<32x256xf32>
    %72 = arith.addf %70, %71 : vector<32x256xf32>
    %73 = arith.addf %72, %1 : vector<32x256xf32>
    %74 = vector.extract_strided_slice %2 {offsets = [0, 3], sizes = [32, 1], strides = [1, 1]} : vector<32x16xf32> to vector<32x1xf32>
    %75 = vector.extract_strided_slice %2 {offsets = [0, 4], sizes = [32, 1], strides = [1, 1]} : vector<32x16xf32> to vector<32x1xf32>
    %76 = vector.extract_strided_slice %2 {offsets = [0, 5], sizes = [32, 1], strides = [1, 1]} : vector<32x16xf32> to vector<32x1xf32>
    %77 = vector.extract_strided_slice %2 {offsets = [0, 12], sizes = [8, 1], strides = [1, 1]} : vector<32x16xf32> to vector<8x1xf32>
    %78 = vector.extract_strided_slice %2 {offsets = [0, 13], sizes = [8, 1], strides = [1, 1]} : vector<32x16xf32> to vector<8x1xf32>
    %c1 = arith.constant 1 : index
    %c0_23 = arith.constant 0 : index
    %c0_24 = arith.constant 0 : index
    %79 = vector.load %arg3[%c1, %c0_23, %c0_24] : memref<3x8x32xbf16, #tpu.memory_space<vmem>>, vector<1x8x32xbf16>
    %80 = vector.shape_cast %79 : vector<1x8x32xbf16> to vector<8x32xbf16>
    %c1_25 = arith.constant 1 : index
    %c0_26 = arith.constant 0 : index
    %c0_27 = arith.constant 0 : index
    %81 = vector.load %arg4[%c1_25, %c0_26, %c0_27] : memref<3x8x24xbf16, #tpu.memory_space<vmem>>, vector<1x8x24xbf16>
    %82 = vector.shape_cast %81 : vector<1x8x24xbf16> to vector<8x24xbf16>
    %c1_28 = arith.constant 1 : index
    %c0_29 = arith.constant 0 : index
    %c0_30 = arith.constant 0 : index
    %83 = vector.load %arg5[%c1_28, %c0_29, %c0_30] : memref<3x32x8xbf16, #tpu.memory_space<vmem>>, vector<1x32x8xbf16>
    %84 = vector.shape_cast %83 : vector<1x32x8xbf16> to vector<32x8xbf16>
    %85 = vector.broadcast %74 : vector<32x1xf32> to vector<32x256xf32>
    %86 = arith.mulf %73, %85 : vector<32x256xf32>
    %87 = vector.broadcast %75 : vector<32x1xf32> to vector<32x256xf32>
    %88 = arith.addf %86, %87 : vector<32x256xf32>
    %cst_31 = arith.constant 0.000000e+00 : f32
    %89 = vector.broadcast %cst_31 : f32 to vector<32x256xf32>
    %90 = arith.cmpf ogt, %88, %89 : vector<32x256xf32>
    %91 = math.exp %88 : vector<32x256xf32>
    %cst_32 = arith.constant 1.000000e+00 : f32
    %92 = vector.broadcast %cst_32 : f32 to vector<32x256xf32>
    %93 = arith.subf %91, %92 : vector<32x256xf32>
    %94 = arith.select %90, %88, %93 : vector<32x256xi1>, vector<32x256xf32>
    %95 = arith.truncf %94 : vector<32x256xf32> to vector<32x256xbf16>
    %cst_33 = arith.constant dense<0.000000e+00> : vector<8x256xf32>
    %96 = tpu.matmul %80, %95, %cst_33 {dimension_numbers = #tpu.dot_dimension_numbers<[1], [0], [0], [1], [0, 0, 1, 1], [], []>} : vector<8x32xbf16>, vector<32x256xbf16>, vector<8x256xf32> -> vector<8x256xf32>
    %97 = vector.broadcast %77 : vector<8x1xf32> to vector<8x256xf32>
    %98 = arith.addf %96, %97 : vector<8x256xf32>
    %cst_34 = arith.constant 0.000000e+00 : f32
    %99 = vector.broadcast %cst_34 : f32 to vector<8x256xf32>
    %100 = arith.cmpf ogt, %98, %99 : vector<8x256xf32>
    %101 = math.exp %98 : vector<8x256xf32>
    %cst_35 = arith.constant 1.000000e+00 : f32
    %102 = vector.broadcast %cst_35 : f32 to vector<8x256xf32>
    %103 = arith.subf %101, %102 : vector<8x256xf32>
    %104 = arith.select %100, %98, %103 : vector<8x256xi1>, vector<8x256xf32>
    %c1_i32_36 = arith.constant 1 : i32
    %105 = tpu.dynamic_rotate %104 by %c1_i32_36 dim 1 : vector<8x256xf32>, i32 -> vector<8x256xf32>
    %106 = vector.broadcast %7 : vector<1x256xf32> to vector<8x256xf32>
    %107 = arith.mulf %105, %106 : vector<8x256xf32>
    %c255_i32_37 = arith.constant 255 : i32
    %108 = tpu.dynamic_rotate %104 by %c255_i32_37 dim 1 : vector<8x256xf32>, i32 -> vector<8x256xf32>
    %109 = vector.broadcast %11 : vector<1x256xf32> to vector<8x256xf32>
    %110 = arith.mulf %108, %109 : vector<8x256xf32>
    %111 = tpu.concatenate %107, %104, %110 in 0 : vector<8x256xf32>, vector<8x256xf32>, vector<8x256xf32> -> vector<24x256xf32>
    %112 = arith.truncf %111 : vector<24x256xf32> to vector<24x256xbf16>
    %cst_38 = arith.constant dense<0.000000e+00> : vector<8x256xf32>
    %113 = tpu.matmul %82, %112, %cst_38 {dimension_numbers = #tpu.dot_dimension_numbers<[1], [0], [0], [1], [0, 0, 1, 1], [], []>} : vector<8x24xbf16>, vector<24x256xbf16>, vector<8x256xf32> -> vector<8x256xf32>
    %114 = vector.broadcast %78 : vector<8x1xf32> to vector<8x256xf32>
    %115 = arith.addf %113, %114 : vector<8x256xf32>
    %cst_39 = arith.constant 0.000000e+00 : f32
    %116 = vector.broadcast %cst_39 : f32 to vector<8x256xf32>
    %117 = arith.cmpf ogt, %115, %116 : vector<8x256xf32>
    %118 = math.exp %115 : vector<8x256xf32>
    %cst_40 = arith.constant 1.000000e+00 : f32
    %119 = vector.broadcast %cst_40 : f32 to vector<8x256xf32>
    %120 = arith.subf %118, %119 : vector<8x256xf32>
    %121 = arith.select %117, %115, %120 : vector<8x256xi1>, vector<8x256xf32>
    %122 = arith.truncf %121 : vector<8x256xf32> to vector<8x256xbf16>
    %cst_41 = arith.constant dense<0.000000e+00> : vector<32x256xf32>
    %123 = tpu.matmul %84, %122, %cst_41 {dimension_numbers = #tpu.dot_dimension_numbers<[1], [0], [0], [1], [0, 0, 1, 1], [], []>} : vector<32x8xbf16>, vector<8x256xbf16>, vector<32x256xf32> -> vector<32x256xf32>
    %124 = vector.broadcast %76 : vector<32x1xf32> to vector<32x256xf32>
    %125 = arith.addf %123, %124 : vector<32x256xf32>
    %126 = arith.addf %125, %73 : vector<32x256xf32>
    %c255_i32_42 = arith.constant 255 : i32
    %127 = tpu.dynamic_rotate %1 by %c255_i32_42 dim 1 : vector<32x256xf32>, i32 -> vector<32x256xf32>
    %128 = arith.maximumf %1, %127 : vector<32x256xf32>
    %c0_43 = arith.constant 0 : index
    %c0_44 = arith.constant 0 : index
    %129 = vector.load %arg7[%c0_43, %c0_44] : memref<256x128xf32, #tpu.memory_space<vmem>>, vector<256x128xf32>
    %cst_45 = arith.constant dense<0.000000e+00> : vector<32x128xf32>
    %130 = tpu.matmul %128, %129, %cst_45 {dimension_numbers = #tpu.dot_dimension_numbers<[1], [0], [0], [1], [0, 0, 1, 1], [], []>} : vector<32x256xf32>, vector<256x128xf32>, vector<32x128xf32> -> vector<32x128xf32>
    %131 = vector.extract_strided_slice %2 {offsets = [0, 6], sizes = [32, 1], strides = [1, 1]} : vector<32x16xf32> to vector<32x1xf32>
    %132 = vector.extract_strided_slice %2 {offsets = [0, 7], sizes = [32, 1], strides = [1, 1]} : vector<32x16xf32> to vector<32x1xf32>
    %133 = vector.extract_strided_slice %2 {offsets = [0, 8], sizes = [32, 1], strides = [1, 1]} : vector<32x16xf32> to vector<32x1xf32>
    %134 = vector.extract_strided_slice %2 {offsets = [0, 14], sizes = [8, 1], strides = [1, 1]} : vector<32x16xf32> to vector<8x1xf32>
    %135 = vector.extract_strided_slice %2 {offsets = [0, 15], sizes = [8, 1], strides = [1, 1]} : vector<32x16xf32> to vector<8x1xf32>
    %c2 = arith.constant 2 : index
    %c0_46 = arith.constant 0 : index
    %c0_47 = arith.constant 0 : index
    %136 = vector.load %arg3[%c2, %c0_46, %c0_47] : memref<3x8x32xbf16, #tpu.memory_space<vmem>>, vector<1x8x32xbf16>
    %137 = vector.shape_cast %136 : vector<1x8x32xbf16> to vector<8x32xbf16>
    %c2_48 = arith.constant 2 : index
    %c0_49 = arith.constant 0 : index
    %c0_50 = arith.constant 0 : index
    %138 = vector.load %arg4[%c2_48, %c0_49, %c0_50] : memref<3x8x24xbf16, #tpu.memory_space<vmem>>, vector<1x8x24xbf16>
    %139 = vector.shape_cast %138 : vector<1x8x24xbf16> to vector<8x24xbf16>
    %c2_51 = arith.constant 2 : index
    %c0_52 = arith.constant 0 : index
    %c0_53 = arith.constant 0 : index
    %140 = vector.load %arg5[%c2_51, %c0_52, %c0_53] : memref<3x32x8xbf16, #tpu.memory_space<vmem>>, vector<1x32x8xbf16>
    %141 = vector.shape_cast %140 : vector<1x32x8xbf16> to vector<32x8xbf16>
    %142 = vector.broadcast %131 : vector<32x1xf32> to vector<32x128xf32>
    %143 = arith.mulf %130, %142 : vector<32x128xf32>
    %144 = vector.broadcast %132 : vector<32x1xf32> to vector<32x128xf32>
    %145 = arith.addf %143, %144 : vector<32x128xf32>
    %cst_54 = arith.constant 0.000000e+00 : f32
    %146 = vector.broadcast %cst_54 : f32 to vector<32x128xf32>
    %147 = arith.cmpf ogt, %145, %146 : vector<32x128xf32>
    %148 = math.exp %145 : vector<32x128xf32>
    %cst_55 = arith.constant 1.000000e+00 : f32
    %149 = vector.broadcast %cst_55 : f32 to vector<32x128xf32>
    %150 = arith.subf %148, %149 : vector<32x128xf32>
    %151 = arith.select %147, %145, %150 : vector<32x128xi1>, vector<32x128xf32>
    %152 = arith.truncf %151 : vector<32x128xf32> to vector<32x128xbf16>
    %cst_56 = arith.constant dense<0.000000e+00> : vector<8x128xf32>
    %153 = tpu.matmul %137, %152, %cst_56 {dimension_numbers = #tpu.dot_dimension_numbers<[1], [0], [0], [1], [0, 0, 1, 1], [], []>} : vector<8x32xbf16>, vector<32x128xbf16>, vector<8x128xf32> -> vector<8x128xf32>
    %154 = vector.broadcast %134 : vector<8x1xf32> to vector<8x128xf32>
    %155 = arith.addf %153, %154 : vector<8x128xf32>
    %cst_57 = arith.constant 0.000000e+00 : f32
    %156 = vector.broadcast %cst_57 : f32 to vector<8x128xf32>
    %157 = arith.cmpf ogt, %155, %156 : vector<8x128xf32>
    %158 = math.exp %155 : vector<8x128xf32>
    %cst_58 = arith.constant 1.000000e+00 : f32
    %159 = vector.broadcast %cst_58 : f32 to vector<8x128xf32>
    %160 = arith.subf %158, %159 : vector<8x128xf32>
    %161 = arith.select %157, %155, %160 : vector<8x128xi1>, vector<8x128xf32>
    %c1_i32_59 = arith.constant 1 : i32
    %162 = tpu.dynamic_rotate %161 by %c1_i32_59 dim 1 : vector<8x128xf32>, i32 -> vector<8x128xf32>
    %163 = vector.broadcast %16 : vector<1x128xf32> to vector<8x128xf32>
    %164 = arith.mulf %162, %163 : vector<8x128xf32>
    %c127_i32_60 = arith.constant 127 : i32
    %165 = tpu.dynamic_rotate %161 by %c127_i32_60 dim 1 : vector<8x128xf32>, i32 -> vector<8x128xf32>
    %166 = vector.broadcast %20 : vector<1x128xf32> to vector<8x128xf32>
    %167 = arith.mulf %165, %166 : vector<8x128xf32>
    %168 = tpu.concatenate %164, %161, %167 in 0 : vector<8x128xf32>, vector<8x128xf32>, vector<8x128xf32> -> vector<24x128xf32>
    %169 = arith.truncf %168 : vector<24x128xf32> to vector<24x128xbf16>
    %cst_61 = arith.constant dense<0.000000e+00> : vector<8x128xf32>
    %170 = tpu.matmul %139, %169, %cst_61 {dimension_numbers = #tpu.dot_dimension_numbers<[1], [0], [0], [1], [0, 0, 1, 1], [], []>} : vector<8x24xbf16>, vector<24x128xbf16>, vector<8x128xf32> -> vector<8x128xf32>
    %171 = vector.broadcast %135 : vector<8x1xf32> to vector<8x128xf32>
    %172 = arith.addf %170, %171 : vector<8x128xf32>
    %cst_62 = arith.constant 0.000000e+00 : f32
    %173 = vector.broadcast %cst_62 : f32 to vector<8x128xf32>
    %174 = arith.cmpf ogt, %172, %173 : vector<8x128xf32>
    %175 = math.exp %172 : vector<8x128xf32>
    %cst_63 = arith.constant 1.000000e+00 : f32
    %176 = vector.broadcast %cst_63 : f32 to vector<8x128xf32>
    %177 = arith.subf %175, %176 : vector<8x128xf32>
    %178 = arith.select %174, %172, %177 : vector<8x128xi1>, vector<8x128xf32>
    %179 = arith.truncf %178 : vector<8x128xf32> to vector<8x128xbf16>
    %cst_64 = arith.constant dense<0.000000e+00> : vector<32x128xf32>
    %180 = tpu.matmul %141, %179, %cst_64 {dimension_numbers = #tpu.dot_dimension_numbers<[1], [0], [0], [1], [0, 0, 1, 1], [], []>} : vector<32x8xbf16>, vector<8x128xbf16>, vector<32x128xf32> -> vector<32x128xf32>
    %181 = vector.broadcast %133 : vector<32x1xf32> to vector<32x128xf32>
    %182 = arith.addf %180, %181 : vector<32x128xf32>
    %183 = arith.addf %182, %130 : vector<32x128xf32>
    %c0_65 = arith.constant 0 : index
    %c0_66 = arith.constant 0 : index
    %184 = vector.load %arg6[%c0_65, %c0_66] : memref<32x32xbf16, #tpu.memory_space<vmem>>, vector<32x32xbf16>
    %185 = vector.extract_strided_slice %2 {offsets = [0, 9], sizes = [32, 1], strides = [1, 1]} : vector<32x16xf32> to vector<32x1xf32>
    %186 = arith.truncf %183 : vector<32x128xf32> to vector<32x128xbf16>
    %cst_67 = arith.constant dense<0.000000e+00> : vector<32x128xf32>
    %187 = tpu.matmul %184, %186, %cst_67 {dimension_numbers = #tpu.dot_dimension_numbers<[1], [0], [0], [1], [0, 0, 1, 1], [], []>} : vector<32x32xbf16>, vector<32x128xbf16>, vector<32x128xf32> -> vector<32x128xf32>
    %188 = vector.broadcast %185 : vector<32x1xf32> to vector<32x128xf32>
    %189 = arith.addf %187, %188 : vector<32x128xf32>
    %190 = arith.negf %189 : vector<32x128xf32>
    %191 = math.exp %190 : vector<32x128xf32>
    %cst_68 = arith.constant 1.000000e+00 : f32
    %192 = vector.broadcast %cst_68 : f32 to vector<32x128xf32>
    %193 = arith.addf %192, %191 : vector<32x128xf32>
    %194 = arith.divf %192, %193 : vector<32x128xf32>
    %c0_69 = arith.constant 0 : index
    %c0_70 = arith.constant 0 : index
    %195 = vector.load %arg8[%c0_69, %c0_70] : memref<128x256xbf16, #tpu.memory_space<vmem>>, vector<128x256xbf16>
    %196 = arith.truncf %194 : vector<32x128xf32> to vector<32x128xbf16>
    %cst_71 = arith.constant dense<0.000000e+00> : vector<32x256xf32>
    %197 = tpu.matmul %196, %195, %cst_71 {dimension_numbers = #tpu.dot_dimension_numbers<[1], [0], [0], [1], [0, 0, 1, 1], [], []>} : vector<32x128xbf16>, vector<128x256xbf16>, vector<32x256xf32> -> vector<32x256xf32>
    %cst_72 = arith.constant 1.000000e+00 : f32
    %198 = vector.broadcast %cst_72 : f32 to vector<32x256xf32>
    %199 = arith.addf %198, %197 : vector<32x256xf32>
    %200 = arith.mulf %199, %126 : vector<32x256xf32>
    %c0_73 = arith.constant 0 : index
    %c0_74 = arith.constant 0 : index
    %c0_75 = arith.constant 0 : index
    %201 = vector.load %arg9[%c0_73, %c0_74, %c0_75] : memref<1x32x256xf32, #tpu.memory_space<vmem>>, vector<1x32x256xf32>
    %202 = vector.shape_cast %201 : vector<1x32x256xf32> to vector<32x256xf32>
    %203 = vector.shape_cast %200 : vector<32x256xf32> to vector<1x32x256xf32>
    tpu.vector_store %arg9[%c0_73, %c0_74, %c0_75], %203 {strides = array<i32>} : memref<1x32x256xf32, #tpu.memory_space<vmem>>, vector<1x32x256xf32>,
    return
  }
  func.func @transform_0(%arg0: i32) -> (i32, i32, i32) {
    %c0_i32 = arith.constant 0 : i32
    %c0_i32_0 = arith.constant 0 : i32
    %c0_i32_1 = arith.constant 0 : i32
    return %arg0, %c0_i32, %c0_i32_0 : i32, i32, i32
  }
  func.func @transform_1(%arg0: i32) -> (i32, i32) {
    %c0_i32 = arith.constant 0 : i32
    %c0_i32_0 = arith.constant 0 : i32
    %c0_i32_1 = arith.constant 0 : i32
    return %c0_i32, %c0_i32_0 : i32, i32
  }
  func.func @transform_2(%arg0: i32) -> (i32, i32, i32) {
    %c0_i32 = arith.constant 0 : i32
    %c0_i32_0 = arith.constant 0 : i32
    %c0_i32_1 = arith.constant 0 : i32
    %c0_i32_2 = arith.constant 0 : i32
    return %c0_i32, %c0_i32_0, %c0_i32_1 : i32, i32, i32
  }
  func.func @transform_3(%arg0: i32) -> (i32, i32, i32) {
    %c0_i32 = arith.constant 0 : i32
    %c0_i32_0 = arith.constant 0 : i32
    %c0_i32_1 = arith.constant 0 : i32
    %c0_i32_2 = arith.constant 0 : i32
    return %c0_i32, %c0_i32_0, %c0_i32_1 : i32, i32, i32
  }
  func.func @transform_4(%arg0: i32) -> (i32, i32, i32) {
    %c0_i32 = arith.constant 0 : i32
    %c0_i32_0 = arith.constant 0 : i32
    %c0_i32_1 = arith.constant 0 : i32
    %c0_i32_2 = arith.constant 0 : i32
    return %c0_i32, %c0_i32_0, %c0_i32_1 : i32, i32, i32
  }
  func.func @transform_5(%arg0: i32) -> (i32, i32) {
    %c0_i32 = arith.constant 0 : i32
    %c0_i32_0 = arith.constant 0 : i32
    %c0_i32_1 = arith.constant 0 : i32
    return %c0_i32, %c0_i32_0 : i32, i32
  }
  func.func @transform_6(%arg0: i32) -> (i32, i32) {
    %c0_i32 = arith.constant 0 : i32
    %c0_i32_0 = arith.constant 0 : i32
    %c0_i32_1 = arith.constant 0 : i32
    return %c0_i32, %c0_i32_0 : i32, i32
  }
  func.func @transform_7(%arg0: i32) -> (i32, i32) {
    %c0_i32 = arith.constant 0 : i32
    %c0_i32_0 = arith.constant 0 : i32
    %c0_i32_1 = arith.constant 0 : i32
    return %c0_i32, %c0_i32_0 : i32, i32
  }
  func.func @transform_8(%arg0: i32) -> (i32, i32, i32) {
    %c0_i32 = arith.constant 0 : i32
    %c0_i32_0 = arith.constant 0 : i32
    %c0_i32_1 = arith.constant 0 : i32
    return %arg0, %c0_i32, %c0_i32_0 : i32, i32, i32
  }
}

</mosaic_0001>

<bundles_post_ra>
// kernel: tpu_custom_call.1
= control target key start
LH: loop header
LB: loop body
LE: loop exit
PB: predicated region body
PF: predicated region fallthrough
CT: control target
= control target key end

     0   :  { %13 = vsyncpa [#allocation3], 0  ;;  %s3452_s0 = inlined_call_operand.hbm [shape: f32[2,32,256], index: 0, kind: input, shape index: {}]   ;;  %s3453_s1 = inlined_call_operand.vmem [shape: f32[32,16], index: 1, kind: input, shape index: {}]   ;;  %s3454_s2 = inlined_call_operand.hbm [shape: bf16[3,8,32], index: 2, kind: input, shape index: {}]   ;;  %s3455_s3 = inlined_call_operand.hbm [shape: bf16[3,8,24], index: 3, kind: input, shape index: {}]   ;;  %s3456_s4 = inlined_call_operand.vmem [shape: bf16[3,32,8], index: 4, kind: input, shape index: {}]   ;;  %s3457_s5 = inlined_call_operand.hbm [shape: bf16[32,32], index: 5, kind: input, shape index: {}]   ;;  %s3458_s6 = inlined_call_operand.hbm [shape: f32[256,128], index: 6, kind: input, shape index: {}]   ;;  %s3459_s7 = inlined_call_operand.vmem [shape: bf16[128,256], index: 7, kind: input, shape index: {}]   ;;  %s3460_s8 = inlined_call_operand.hbm [shape: f32[2,32,256], index: 8, kind: output, shape index: {}]  }
   0x1   :  { %15 = vsyncpa [#allocation3 + $0x1], 0 }
   0x2   :  { %16 = vsyncpa [#allocation6], 0 }
   0x3   :  { %17 = vsyncpa [#allocation9], 0 }
   0x4   :  { %18 = vsyncpa [#allocation4], 0 }
   0x5   :  { %20 = vsyncpa [#allocation4 + $0x1], 0  ;;  %s2741_s27 = smov 0   ;;  %s2743_s28 = smov 0  }
   0x6   :  { %s2745_s29 = smov 0   ;;  %s2747_s30 = smov 0  }
   0x7 LB: > { %3466 = sst [smem:[#allocation16_spill]] %s2648_s27  ;;  %s2762_s9 = sadd.s32 4294967295, %s2660_s30   ;;  %s2660_s30 = sphi %s2747_s30, %s3490_s30   ;;  %s2656_s29 = sphi %s2745_s29, %s3489_s29   ;;  %s2652_s28 = sphi %s2743_s28, %s3488_s28   ;;  %s2648_s27 = sphi %s2741_s27, %s3487_s27  }
   0x8   : > { %s1934_s10 = sadd.s32 4294967294, %s2660_s30   ;;  %p46_p0 = scmp.ne.s32.totalorder %s2652_s28, %s2648_s27 }
   0x9   : > { %p3461_p1 = scmp.eq.s32.totalorder %s2762_s9, 0  ;;  %p223_p3 = scmp.eq.s32.totalorder %s1934_s10, 1 }
   0xa   : > { %p1935_p5 = scmp.ge.s32.totalorder %s2660_s30, 1  ;;  %p230_p7 = scmp.lt.s32.totalorder %s2660_s30, 3 }
   0xb   : > { %p2771_p4 = por %p3461_p1, %p46_p0  ;;  %p2776_p6 = por %p223_p3, %p46_p0 }
   0xc   : > { %p2781_p8 = pnand %p1935_p5, %p230_p7  ;;  %s2662_s14 = smov [#allocation5]  }
   0xd   : > { %s3467_s11 = scalar_select %p2771_p4, 1, 0 }
   0xe   : > { %s3468_s12 = scalar_select %p2776_p6, 1, 0 }
   0xf   : > { %s3470_s13 = scalar_select %p2781_p8, 1, 0 }
  0x10   : > { %3469 = sst [smem:[#allocation17_spill]] %s3468_s12  ;;  %s245_s15 = sshll.u32 %s2662_s14, 4  ;;  %s2785_s15 = int_to_ptr.vmem [resolvable:$true] %s245_s15 }
  0x11   : > { %p2185_p9 = pneg %p2781_p8  ;;  %s2663_s17 = smov [#allocation8]  }
  0x12   : > { %s274_s18 = sshll.u32 %s2663_s17, 4  ;;  %s2664_s19 = smov [#allocation7]   ;;  %s2796_s18 = int_to_ptr.vmem [resolvable:$true] %s274_s18 }
  0x13   : > { %p2792_p11 = pnand %p2185_p9, %p3461_p1  ;;  %s2798_s20 = sshll.u32 %s2664_s19, 4  ;;  %s259_s20 = int_to_ptr.vmem [resolvable:$true] %s2798_s20 }
  0x14   : > { %s2444_s23 = scalar_lea.hbm %s3454_s2, 192 }
  0x15   : > { %p2445_p12 = scmp.ne.s32.totalorder %s3454_s2, %s2444_s23  ;;  %p2808_p13 = pneg %p2792_p11 }
  0x16   : > { %p2451_p5 = scmp.lt.u32.totalorder %s2444_s23, %s3454_s2 }
  0x17   : > { %p2447_p0 = pnand %p2808_p13, %p2445_p12 }
  0x19   : > { %p2448_p3 = pneg %p2447_p0 }
  0x1b   : > { %p2453_p7 = pnand %p2451_p5, %p2448_p3 }
  0x1d   : > { %2456 = shalt.err (!%p2453_p7)
}
  0x1e   : > { %s2457_s17 = scalar_lea.vmem %s2785_s15, 192  ;;  %p2465_p2 = scmp.lt.s32.totalorder %s2785_s15, %s2785_s15 }
  0x1f   : > { %p2458_p9 = scmp.ne.s32.totalorder %s2785_s15, %s2457_s17  ;;  %p2466_p6 = scmp.lt.s32.totalorder %s2457_s17, %s2457_s17 }
  0x21   : > { %p2460_p10 = pnand %p2458_p9, %p2808_p13  ;;  %p2467_p12 = por %p2466_p6, %p2465_p2 }
  0x23   : > { %p2461_p1 = pneg %p2460_p10 }
  0x25   : > { %p2468_p0 = pnand %p2467_p12, %p2461_p1 }
  0x27   : > { %2471 = shalt.err (!%p2468_p0)
}
  0x28   : > { %s2665_s19 = smov 64   ;;  %s2666_s21 = smov 4  }
  0x29   : > { %2188 = dma.hbm_to_vmem [thread:$0]  (!%p2792_p11), %s3454_s2, 192, %s2785_s15, [#allocation6], %s2665_s19, %s2665_s19, %s2666_s21  }
  0x2a   : > { %s2472_s10 = scalar_lea.hbm %s3457_s5, 256 }
  0x2b   : > { %p2473_p1 = scmp.ne.s32.totalorder %s3457_s5, %s2472_s10  ;;  %p2479_p10 = scmp.lt.u32.totalorder %s2472_s10, %s3457_s5 }
  0x2d   : > { %p2475_p2 = pnand %p2473_p1, %p2808_p13 }
  0x2f   : > { %p2476_p6 = pneg %p2475_p2 }
  0x31   : > { %p2481_p3 = pnand %p2479_p10, %p2476_p6 }
  0x33   : > { %2484 = shalt.err (!%p2481_p3)
}
  0x34   : > { %s2485_s15 = scalar_lea.vmem %s2796_s18, 256  ;;  %p2493_p12 = scmp.lt.s32.totalorder %s2796_s18, %s2796_s18 }
  0x35   : > { %p2486_p5 = scmp.ne.s32.totalorder %s2796_s18, %s2485_s15  ;;  %p2494_p0 = scmp.lt.s32.totalorder %s2485_s15, %s2485_s15 }
  0x37   : > { %p2488_p7 = pnand %p2486_p5, %p2808_p13  ;;  %p2495_p1 = por %p2494_p0, %p2493_p12 }
  0x39   : > { %p2489_p9 = pneg %p2488_p7 }
  0x3b   : > { %p2496_p2 = pnand %p2495_p1, %p2489_p9 }
  0x3d   : > { %2499 = shalt.err (!%p2496_p2)
}
  0x3e   : > { %2194 = dma.hbm_to_vmem [thread:$0]  (!%p2792_p11), %s3457_s5, 256, %s2796_s18, [#allocation9], %s2665_s19, %s2665_s19, %s2666_s21  }
  0x3f   : > { %s2500_s24 = scalar_lea.hbm %s3455_s3, 192 }
  0x40   : > { %p2501_p6 = scmp.ne.s32.totalorder %s3455_s3, %s2500_s24  ;;  %p2507_p5 = scmp.lt.u32.totalorder %s2500_s24, %s3455_s3 }
  0x42   : > { %p2503_p10 = pnand %p2501_p6, %p2808_p13 }
  0x44   : > { %p2504_p3 = pneg %p2503_p10 }
  0x46   : > { %p2509_p7 = pnand %p2507_p5, %p2504_p3 }
  0x48   : > { %2512 = shalt.err (!%p2509_p7)
}
  0x49   : > { %s2513_s15 = scalar_lea.vmem %s259_s20, 192  ;;  %p2521_p1 = scmp.lt.s32.totalorder %s259_s20, %s259_s20 }
  0x4a   : > { %p2514_p9 = scmp.ne.s32.totalorder %s259_s20, %s2513_s15  ;;  %p2522_p2 = scmp.lt.s32.totalorder %s2513_s15, %s2513_s15 }
  0x4c   : > { %p2516_p12 = pnand %p2514_p9, %p2808_p13  ;;  %p2523_p4 = por %p2522_p2, %p2521_p1 }
  0x4e   : > { %p2517_p0 = pneg %p2516_p12 }
  0x50   : > { %p2524_p8 = pnand %p2523_p4, %p2517_p0 }
  0x52   : > { %2527 = shalt.err (!%p2524_p8)
}
  0x53   : > { %2191 = dma.hbm_to_vmem [thread:$0]  (!%p2792_p11), %s3455_s3, 192, %s259_s20, [#allocation6], %s2665_s19, %s2665_s19, %s2666_s21  }
  0x54   : > { %s2667_s12 = smov [#allocation10]   ;;  %s2528_s25 = scalar_lea.hbm %s3458_s6, 4096 }
  0x55   : > { %s287_s22 = sshll.u32 %s2667_s12, 4  ;;  %p2529_p4 = scmp.ne.s32.totalorder %s3458_s6, %s2528_s25  ;;  %s288_s22 = int_to_ptr.vmem [resolvable:$true] %s287_s22 }
  0x56   : > { %p2535_p10 = scmp.lt.u32.totalorder %s2528_s25, %s3458_s6 }
  0x57   : > { %p2531_p8 = pnand %p2529_p4, %p2808_p13 }
  0x59   : > { %p2532_p6 = pneg %p2531_p8 }
  0x5b   : > { %p2537_p3 = pnand %p2535_p10, %p2532_p6 }
  0x5d   : > { %2540 = shalt.err (!%p2537_p3)
}
  0x5e   : > { %s2541_s20 = scalar_lea.vmem %s288_s22, 4096  ;;  %p2549_p12 = scmp.lt.s32.totalorder %s288_s22, %s288_s22 }
  0x5f   : > { %p2542_p5 = scmp.ne.s32.totalorder %s288_s22, %s2541_s20  ;;  %p2550_p0 = scmp.lt.s32.totalorder %s2541_s20, %s2541_s20 }
  0x61   : > { %p2544_p7 = pnand %p2542_p5, %p2808_p13  ;;  %p2551_p1 = por %p2550_p0, %p2549_p12 }
  0x63   : > { %p2545_p9 = pneg %p2544_p7 }
  0x65   : > { %p2552_p2 = pnand %p2551_p1, %p2545_p9 }
  0x67   : > { %2555 = shalt.err (!%p2552_p2)
}
  0x68   : > { %s2668_s19 = smov 128   ;;  %s2669_s26 = smov 8  }
  0x69   : > { %2197 = dma.hbm_to_vmem [thread:$0]  (!%p2792_p11), %s3458_s6, 4096, %s288_s22, [#allocation9], %s2668_s19, %s2668_s19, %s2669_s26  }
  0x6a   : > { %s2899_s27 = sadd.s32 1, %s2660_s30   ;;  %s33_s23 = sadd.s32 1, %s2656_s29 }
  0x6b   : > { %s30_s12 = ssub.s32 %s2660_s30, %s2899_s27  ;;  %p40_p4 = scmp.ne.s32.totalorder %s2656_s29, %s2652_s28 }
  0x6c   : > { %p31_p13 = scmp.eq.s32.totalorder %s30_s12, 0  ;;  %p41_p8 = scmp.eq.s32.totalorder %s2660_s30, 0 }
  0x6d   : > { %p3473_p10 = scmp.eq.s32.totalorder %s2762_s9, 1  ;;  %p2210_p5 = scmp.lt.s32.totalorder %s2660_s30, 2 }
  0x6e   : > { %s2908_s24 = scalar_select %p31_p13, %s2656_s29, %s33_s23  }
  0x6f   : > { %p42_p6 = por %p41_p8, %p40_p4  ;;  %p2912_p3 = por %p3473_p10, %p40_p4 }
  0x70   : > { %s304_s16 = sand.u32 1, %s2656_s29   ;;  %s2043_s22 = sshll.u32 %s2660_s30, 10 }
  0x71   : > { %s1941_s10 = sshll.u32 %s304_s16, 6  ;;  %s2922_s15 = scalar_lea.hbm %s3452_s0, %s2043_s22 }
  0x72   : > { %s308_s20 = scalar_lea.vmem [#allocation2], %s1941_s10  ;;  %p2926_p11 = pnand %p2210_p5, %p42_p6 }
  0x73   : > { %s315_s19 = sshll.u32 %s308_s20, 4  ;;  %s2930_s21 = scalar_lea.sflag [#allocation3], %s304_s16  ;;  %s2924_s19 = int_to_ptr.vmem [resolvable:$true] %s315_s19 }
  0x74   : > { %s2556_s18 = scalar_lea.hbm %s2922_s15, 1024  ;;  %p2558_p9 = pneg %p2926_p11 }
  0x75   : > { %p2557_p7 = scmp.ne.s32.totalorder %s2922_s15, %s2556_s18  ;;  %s2561_s10 = scalar_lea.hbm %s3452_s0, 2048 }
  0x76   : > { %p2562_p1 = scmp.lt.u32.totalorder %s2922_s15, %s3452_s0  ;;  %p2563_p2 = scmp.lt.u32.totalorder %s2561_s10, %s2556_s18 }
  0x77   : > { %p2559_p12 = pnand %p2558_p9, %p2557_p7  ;;  %p2565_p4 = scmp.lt.u32.totalorder %s2556_s18, %s2922_s15 }
  0x78   : > { %p2564_p13 = por %p2563_p2, %p2562_p1 }
  0x79   : > { %p2560_p0 = pneg %p2559_p12 }
  0x7a   : > { %p2566_p8 = por %p2565_p4, %p2564_p13 }
  0x7c   : > { %p2567_p6 = pnand %p2566_p8, %p2560_p0 }
  0x7e   : > { %2570 = shalt.err (!%p2567_p6)
}
  0x7f   : > { %s2571_s16 = scalar_lea.vmem %s2924_s19, 1024  ;;  %s2670_s17 = smov [#allocation2]  }
  0x80   : > { %p2572_p10 = scmp.ne.s32.totalorder %s2924_s19, %s2571_s16  ;;  %s2576_s20 = sshll.u32 %s2670_s17, 4  ;;  %s2577_s20 = int_to_ptr.vmem [resolvable:$false] %s2576_s20 }
  0x81   : > { %s2578_s12 = scalar_lea.vmem %s2577_s20, 2048  ;;  %p2579_p12 = scmp.lt.s32.totalorder %s2924_s19, %s2577_s20 }
  0x82   : > { %p2574_p5 = pnand %p2572_p10, %p2558_p9  ;;  %p2580_p1 = scmp.lt.s32.totalorder %s2578_s12, %s2571_s16 }
  0x84   : > { %p2575_p7 = pneg %p2574_p5  ;;  %p2581_p2 = por %p2580_p1, %p2579_p12 }
  0x86   : > { %p2582_p13 = pnand %p2581_p2, %p2575_p7 }
  0x88   : > { %2585 = shalt.err (!%p2582_p13)
}
  0x89   : > { %s2671_s18 = smov 256   ;;  %s2672_s23 = smov 16  }
  0x8a   : > { %2201 = dma.hbm_to_vmem [thread:$0]  (!%p2926_p11), %s2922_s15, 1024, %s2924_s19, %s2930_s21, %s2671_s18, %s2671_s18, %s2672_s23  }
  0x8b   : > { %p3476_p9 = scmp.ne.s32.totalorder %s3470_s13, 0 }
  0x8c   : > { %s2961_s10 = sand.u32 (!%p3476_p9), 1, %s2652_s28   ;;  %p3477_p0 = scmp.ne.s32.totalorder (!%p3476_p9), %s3467_s11, 0 }
  0x8d   : > { %327 = sbr.rel (%p3476_p9) target bundleno = 3128 (0xc38), region = 52  ;;  %s1945_s22 = sshll.u32 (!%p3476_p9), %s2961_s10, 6 }
  0x8e   : > { %s330_s14 = scalar_lea.sflag (!%p3476_p9), [#allocation3], %s2961_s10  ;;  %s2967_s16 = scalar_lea.vmem (!%p3476_p9), [#allocation2], %s1945_s22 }
  0x94   : > { %2631 = dma.done.wait (%p3477_p0), %s330_s14, 1024  }
  0x95   : > { %2633 = vsyncadd (%p3477_p0), %s330_s14, 4294966272  ;;  %p3478_p11 = scmp.eq.s32.totalorder %s2762_s9, 0 }
  0x97   : > { %2635 = dma.done.wait (%p3478_p11), [#allocation6], 384   ;;  %p3479_p4 = pmov %p3478_p11 }
  0x99   : > { %2637 = vsyncadd (%p3479_p4), [#allocation6], 4294966912  ;;  %p3480_p8 = pmov %p3479_p4 }
  0x9a   : > { %p3481_p6 = pmov %p3479_p4 }
  0x9b   : > { %2639 = dma.done.wait (%p3480_p8), [#allocation9], 4352  }
  0x9c   : > { %2641 = vsyncadd (%p3481_p6), [#allocation9], 4294962944  ;;  %v2673_v0 = vmov 1   ;;  %v2674_v1 = vmov 0   ;;  %v2987_v2 = vld [vmem:[%s3453_s1] sm:$0xff]  ;;  %v2994_v3 = vld [vmem:[%s3453_s1 + $0x8] sm:$0xff] }
  0x9d   : > { %2281 = vset.pattern.permute.xlu1 %v2673_v0  ;;  %2280 = vset.pattern.permute.xlu0 %v2674_v1  ;;  %v2999_v4 = vld [vmem:[%s3453_s1 + $0x10] sm:$0xff]  ;;  %v3006_v5 = vld [vmem:[%s3453_s1 + $0x18] sm:$0xff]  ;;  %v2675_v6 = vmov 10   ;;  %v3015_v7 = vld [vmem:[%s2967_s16] sm:$0xff]  ;;  %vm519_vm8 = vcmask 261120   ;;  %s2676_s12 = smov 1  }
  0x9e   : > { %555 = vmatprep.mubr.bf16.mxu0 %v2674_v1  ;;  %903 = vmatprep.mubr.bf16.mxu1 %v2674_v1  ;;  %v3018_v8 = vld [vmem:[%s2967_s16 + $0x8] sm:$0xff]  ;;  %v3023_v13 = vld [vmem:[%s2967_s16 + $0x10] sm:$0xff]  ;;  %v3026_v14 = vld [vmem:[%s2967_s16 + $0x18] sm:$0xff]  ;;  %s2678_s18 = smov 127   ;;  %vm603_vm15 = vcmask 1043456   ;;  %s2044_s11 = sshll.u32 %s2762_s9, 10 }
  0x9f   : > { %448 = vperm.xlu1 %2281, %v2987_v2   ;;  %421 = vperm.xlu0 %2280, %v2987_v2   ;;  %v3031_v28 = vld [vmem:[%s2967_s16 + $0x20] sm:$0xff]  ;;  %v3034_v29 = vld [vmem:[%s2967_s16 + $0x28] sm:$0xff]  ;;  %v3037_v31 = vld [vmem:[%s2967_s16 + $0x30] sm:$0xff]  ;;  %s2693_s19 = smov [#allocation11]  }
  0xa0   : > { %v3040_v32 = vld [vmem:[%s2967_s16 + $0x38] sm:$0xff]  ;;  %s3384_s16 = scalar_lea.vmem [#allocation11], %s1945_s22  ;;  %s2590_s26 = sshll.u32 %s2693_s19, 4  ;;  %s2591_s26 = int_to_ptr.vmem [resolvable:$false] %s2590_s26 }
  0xa1   : > { %s1823_s22 = sshll.u32 %s3384_s16, 4  ;;  %s2592_s21 = scalar_lea.vmem %s2591_s26, 2048  ;;  %s3399_s22 = int_to_ptr.vmem [resolvable:$true] %s1823_s22 }
  0xa2   : > { %s2586_s15 = scalar_lea.vmem %s3399_s22, 1024  ;;  %p2593_p12 = scmp.lt.s32.totalorder %s3399_s22, %s2591_s26 }
  0xa3   : > { %452 = vperm.xlu1 %2281, %v2994_v3   ;;  %426 = vperm.xlu0 %2280, %v2994_v3   ;;  %p2587_p10 = scmp.ne.s32.totalorder %s3399_s22, %s2586_s15  ;;  %p2594_p1 = scmp.lt.s32.totalorder %s2592_s21, %s2586_s15 }
  0xa5   : > { %p2588_p5 = pnand %p2587_p10, %p2912_p3  ;;  %p2595_p2 = por %p2594_p1, %p2593_p12 }
  0xa7   : > { %2282 = vset.pattern.permute.xlu1 %v2674_v1  ;;  %431 = vperm.xlu0 %2280, %v2999_v4   ;;  %p2589_p7 = pneg %p2588_p5 }
  0xa8   : > { %436 = vperm.xlu1 %2282, %v3006_v5  }
  0xa9   : > { %p2596_p13 = pnand %p2595_p2, %p2589_p7 }
  0xab   : > { %2283 = vset.pattern.permute.xlu0 %v2673_v0 }
  0xac   : > { %2284 = vset.pattern.permute.xlu1 %v2673_v0  ;;  %456 = vperm.xlu0 %2283, %v2999_v4  }
  0xad   : > { %460 = vperm.xlu1 %2284, %v3006_v5  }
  0xb1   : > { %2285 = vset.pattern.permute.xlu1 %v2675_v6 }
  0xb2   : > { %516 = vperm.xlu1 %2285, %v2987_v2  }
 0x11e   : > { %v449_v9 = vpop.permute.xlu1 %448  ;;  %v422_v10 = vpop.permute.xlu0 %421 }
 0x11f   : > { %v439_v11 = vmul.f32 %v422_v10, %v3015_v7  ;;  %v440_v12 = vmul.f32 %v422_v10, %v3018_v8 }
 0x121   : > { %v463_v15 = vadd.f32 %v449_v9, %v439_v11  ;;  %v464_v16 = vadd.f32 %v449_v9, %v440_v12 }
 0x122   : > { %v453_v17 = vpop.permute.xlu1 %452  ;;  %v427_v18 = vpop.permute.xlu0 %426 }
 0x123   : > { %v479_v19 = vmul.f32 1.442695, %v463_v15  ;;  %v481_v20 = vmul.f32 1.442695, %v464_v16  ;;  %v441_v21 = vmul.f32 %v427_v18, %v3023_v13  ;;  %v442_v22 = vmul.f32 %v427_v18, %v3026_v14 }
 0x124   : > { %vm471_vm0 = vcmp.gt.f32.partialorder %v463_v15, 0.0  ;;  %vm472_vm2 = vcmp.gt.f32.partialorder %v464_v16, 0.0 }
 0x125   : > { %2364 = vpow2.f32 %v479_v19  ;;  %v465_v23 = vadd.f32 %v453_v17, %v441_v21  ;;  %v466_v24 = vadd.f32 %v453_v17, %v442_v22 }
 0x126   : > { %v432_v25 = vpop.permute.xlu0 %431  ;;  %2366 = vpow2.f32 %v481_v20  ;;  %v413_v20 = vld [vmem:[#allocation5] sm:$0xf] }
 0x127   : > { %v483_v26 = vmul.f32 1.442695, %v465_v23  ;;  %v485_v27 = vmul.f32 1.442695, %v466_v24  ;;  %v437_v30 = vpop.permute.xlu1 %436  ;;  %v443_v33 = vmul.f32 %v432_v25, %v3031_v28  ;;  %v444_v34 = vmul.f32 %v432_v25, %v3034_v29 }
 0x128   : > { %v445_v35 = vmul.f32 %v437_v30, %v3037_v31  ;;  %v446_v36 = vmul.f32 %v437_v30, %v3040_v32  ;;  %vm473_vm1 = vcmp.gt.f32.partialorder %v465_v23, 0.0  ;;  %vm474_vm3 = vcmp.gt.f32.partialorder %v466_v24, 0.0 }
 0x129   : > { %2368 = vpow2.f32 %v483_v26 }
 0x12a   : > { %2370 = vpow2.f32 %v485_v27 }
 0x12b   : > { %v457_v37 = vpop.permute.xlu0 %456 }
 0x12c   : > { %v467_v38 = vadd.f32 %v457_v37, %v443_v33  ;;  %v468_v39 = vadd.f32 %v457_v37, %v444_v34  ;;  %v461_v40 = vpop.permute.xlu1 %460 }
 0x12d   : > { %v469_v41 = vadd.f32 %v461_v40, %v445_v35  ;;  %v470_v42 = vadd.f32 %v461_v40, %v446_v36  ;;  %v2677_v40 = vmov 11  }
 0x12e   : > { %v487_v43 = vmul.f32 1.442695, %v467_v38  ;;  %v489_v44 = vmul.f32 1.442695, %v468_v39  ;;  %vm475_vm4 = vcmp.gt.f32.partialorder %v467_v38, 0.0  ;;  %vm476_vm5 = vcmp.gt.f32.partialorder %v468_v39, 0.0  ;;  %2286 = vset.pattern.permute.xlu0 %v2677_v40 }
 0x12f   : > { %v2365_v45 = vpop.eup %2364  ;;  %v491_v46 = vmul.f32 1.442695, %v469_v41  ;;  %v493_v47 = vmul.f32 1.442695, %v470_v42  ;;  %vm477_vm6 = vcmp.gt.f32.partialorder %v469_v41, 0.0  ;;  %vm478_vm7 = vcmp.gt.f32.partialorder %v470_v42, 0.0 }
 0x130   : > { %v2367_v48 = vpop.eup %2366  ;;  %2372 = vpow2.f32 %v487_v43  ;;  %v1954_v49 = vadd.f32 -1.0, %v2365_v45  ;;  %v2679_v45 = vmov 0.0  }
 0x131   : > { %2374 = vpow2.f32 %v489_v44  ;;  %v1955_v51 = vadd.f32 -1.0, %v2367_v48  ;;  %v517_v21 = vpop.permute.xlu1 %516 }
 0x132   : > { %2376 = vpow2.f32 %v491_v46  ;;  %v503_v55 = vsel %vm471_vm0, %v463_v15, %v1954_v49  ;;  %vm599_vm0 = vcmask 195584  }
 0x133   : > { %v2369_v50 = vpop.eup %2368  ;;  %2378 = vpow2.f32 %v493_v47  ;;  %v504_v57 = vsel %vm472_vm2, %v464_v16, %v1955_v51 }
 0x134   : > { %v2371_v52 = vpop.eup %2370  ;;  %v1956_v53 = vadd.f32 -1.0, %v2369_v50 }
 0x135   : > { %v1957_v54 = vadd.f32 -1.0, %v2371_v52 }
 0x136   : > { %v505_v56 = vsel %vm473_vm1, %v465_v23, %v1956_v53 }
 0x137   : > { %v506_v58 = vsel %vm474_vm3, %v466_v24, %v1957_v54  ;;  %v511_v59 = vpack.c.bf16 %v505_v56, %v503_v55  ;;  %vm689_vm3 = vcmask 64512  }
 0x138   : > { %v512_v60 = vpack.c.bf16 %v506_v58, %v504_v57 }
 0x13a   : > { %v2373_v61 = vpop.eup %2372  ;;  %523 = vmatprep.subr.bf16.mxu0 %v512_v60 }
 0x13b   : > { %v2375_v62 = vpop.eup %2374  ;;  %524 = vmatpush1.bf16.msra.mxu0 %v511_v59  ;;  %v1958_v63 = vadd.f32 -1.0, %v2373_v61 }
 0x13c   : > { %v2377_v0 = vpop.eup %2376  ;;  %v1959_v6 = vadd.f32 -1.0, %v2375_v62  ;;  %v414_v62 = vld [vmem:[#allocation7] sm:$0xf] }
 0x13d   : > { %v2379_v9 = vpop.eup %2378  ;;  %v1960_v10 = vadd.f32 -1.0, %v2377_v0  ;;  %v507_v11 = vsel %vm475_vm4, %v467_v38, %v1958_v63  ;;  %v2680_v63 = vmov 2   ;;  %v2681_v0 = vmov 3  }
 0x13e   : > { %v1961_v12 = vadd.f32 -1.0, %v2379_v9  ;;  %v508_v15 = vsel %vm476_vm5, %v468_v39, %v1959_v6  ;;  %2287 = vset.pattern.permute.xlu1 %v2680_v63  ;;  %v2682_v6 = vmov 4  }
 0x13f   : > { %v509_v16 = vsel %vm477_vm6, %v469_v41, %v1960_v10  ;;  %v395_v41 = vlaneseq }
 0x140   : > { %v510_v17 = vsel %vm478_vm7, %v470_v42, %v1961_v12  ;;  %v513_v18 = vpack.c.bf16 %v509_v16, %v507_v11 }
 0x141   : > { %v514_v19 = vpack.c.bf16 %v510_v17, %v508_v15  ;;  %v3053_v42 = vand.u32 127, %v395_v41 }
 0x143   : > { %525 = vmatprep.subr.bf16.mxu0 %v514_v19  ;;  %vm398_vm11 = vcmp.gt.s32.totalorder %v3053_v42, 0  ;;  %v397_v43 = vadd.s32 128, %v3053_v42  ;;  %vm578_vm12 = vcmp.lt.s32.totalorder %v3053_v42, 1  ;;  %vm410_vm14 = vcmp.lt.s32.totalorder %v3053_v42, 127 }
 0x144   : > { %526 = vmatpush1.bf16.msra.mxu0 %v513_v18  ;;  %v3059_v46 = vsel %vm398_vm11, 1.0, %v2679_v45 }
 0x145   : > { %vm405_vm13 = vcmp.lt.s32.totalorder %v397_v43, 255 }
 0x146   : > { %v3068_v53 = vsel %vm405_vm13, 1.0, %v2679_v45 }
 0x147   : > { %1962 = vmatmul.mubr.msk.bf16.vlgmr.msra.gmra.mrb[0].mxu0 %vm519_vm8, %v413_v20 }
 0x148   : > { %642 = vmatprep.mubr.bf16.mxu0 %v2674_v1 }
 0x21a   : > { %v557_v22 = vpop.f32.mrb[0].mxu0 }
 0x21b   : > { %v558_v23 = vadd.f32 %v557_v22, %v517_v21  ;;  %v559_v24 = vpop.f32.mrb[1].mxu0 }
 0x21c   : > { %v560_v25 = vadd.f32 %v559_v24, %v517_v21  ;;  %v561_v26 = vpop.f32.mrb[2].mxu0 }
 0x21d   : > { %v566_v27 = vmul.f32 1.442695, %v558_v23  ;;  %v562_v30 = vpop.f32.mrb[3].mxu0  ;;  %vm564_vm9 = vcmp.gt.f32.partialorder %v558_v23, 0.0 }
 0x21e   : > { %v568_v33 = vmul.f32 1.442695, %v560_v25  ;;  %vm565_vm10 = vcmp.gt.f32.partialorder %v560_v25, 0.0 }
 0x21f   : > { %2380 = vpow2.f32 %v566_v27 }
 0x220   : > { %2382 = vpow2.f32 %v568_v33  ;;  %v2332_v33 = vld [vmem:[%s3456_s4] sm:$0xff]  }
 0x229   : > { %v2381_v34 = vpop.eup %2380 }
 0x22a   : > { %v2383_v35 = vpop.eup %2382  ;;  %v1963_v36 = vadd.f32 -1.0, %v2381_v34  ;;  %v2333_v34 = vld [vmem:[%s3456_s4 + $0x8] sm:$0xff]  }
 0x22b   : > { %v1964_v37 = vadd.f32 -1.0, %v2383_v35  ;;  %v2683_v35 = vmov 12  }
 0x22c   : > { %v572_v38 = vsel %vm564_vm9, %v558_v23, %v1963_v36 }
 0x22d   : > { %574 = vrot.lane.b32.xlu0 %v572_v38, %s2676_s12  ;;  %v573_v39 = vsel %vm565_vm10, %v560_v25, %v1964_v37 }
 0x22e   : > { %576 = vrot.lane.b32.xlu1 %v573_v39, %s2676_s12 }
 0x231   : > { %583 = vrot.lane.b32.xlu0 %v572_v38, %s2678_s18 }
 0x232   : > { %585 = vrot.lane.b32.xlu1 %v573_v39, %s2678_s18 }
 0x235   : > { %596 = vperm.xlu0 %2286, %v2987_v2  }
 0x236   : > { %664 = vperm.xlu1 %2287, %v2987_v2  }
 0x239   : > { %2288 = vset.pattern.permute.xlu0 %v2680_v63 }
 0x23a   : > { %672 = vperm.xlu0 %2288, %v2999_v4   ;;  %668 = vperm.xlu1 %2287, %v2994_v3  }
 0x23e   : > { %2290 = vset.pattern.permute.xlu0 %v2681_v0  ;;  %676 = vperm.xlu1 %2287, %v3006_v5  }
 0x23f   : > { %777 = vperm.xlu0 %2290, %v2994_v3  }
 0x242   : > { %2289 = vset.pattern.permute.xlu1 %v2681_v0 }
 0x243   : > { %781 = vperm.xlu0 %2290, %v2999_v4   ;;  %773 = vperm.xlu1 %2289, %v2987_v2  }
 0x247   : > { %2293 = vset.pattern.permute.xlu0 %v2682_v6  ;;  %2291 = vset.pattern.permute.xlu1 %v2682_v6 }
 0x248   : > { %805 = vperm.xlu0 %2293, %v2999_v4   ;;  %797 = vperm.xlu1 %2291, %v2987_v2  }
 0x24c   : > { %801 = vperm.xlu1 %2291, %v2994_v3  }
 0x250   : > { %2292 = vset.pattern.permute.xlu1 %v2681_v0 }
 0x251   : > { %785 = vperm.xlu1 %2292, %v3006_v5  }
 0x255   : > { %2294 = vset.pattern.permute.xlu1 %v2682_v6 }
 0x256   : > { %809 = vperm.xlu1 %2294, %v3006_v5  }
 0x25a   : > { %2295 = vset.pattern.permute.xlu1 %v2683_v35 }
 0x25b   : > { %865 = vperm.xlu1 %2295, %v2987_v2  }
 0x29f   : > { %v575_v44 = vpop.permute.xlu0 %574 }
 0x2a0   : > { %v577_v47 = vpop.permute.xlu1 %576 }
 0x2a1   : > { %v579_v48 = vsel %vm578_vm12, %v575_v44, %v577_v47  ;;  %v580_v49 = vsel %vm578_vm12, %v577_v47, %v575_v44 }
 0x2a2   : > { %v581_v50 = vmul.f32 %v3059_v46, %v580_v49  ;;  %v592_v51 = vpack.c.bf16 %v573_v39, %v579_v48 }
 0x2a3   : > { %v584_v52 = vpop.permute.xlu0 %583 }
 0x2a4   : > { %v591_v54 = vpack.c.bf16 %v572_v38, %v581_v50  ;;  %v586_v55 = vpop.permute.xlu1 %585  ;;  %610 = vmatprep.subr.bf16.mxu0 %v592_v51 }
 0x2a5   : > { %v587_v56 = vsel %vm410_vm14, %v584_v52, %v586_v55  ;;  %v588_v57 = vsel %vm410_vm14, %v586_v55, %v584_v52 }
 0x2a6   : > { %v590_v58 = vmul.f32 %v3068_v53, %v588_v57  ;;  %v593_v59 = vpack.c.bf16 %v587_v56, %v587_v56  ;;  %611 = vmatpush1.bf16.msra.mxu0 %v591_v54 }
 0x2a8   : > { %v594_v60 = vpack.c.bf16 %v590_v58, %v590_v58  ;;  %v605_v61 = vsel %vm603_vm15, %v593_v59, 0 }
 0x2aa   : > { %1965 = vmatprep.subr.msk.bf16.mxu0 %vm603_vm15, %v594_v60 }
 0x2ab   : > { %613 = vmatpush1.bf16.msra.mxu0 %v605_v61 }
 0x2ae   : > { %1966 = vmatmul.mubr.msk.bf16.vlgmr.msra.gmra.mrb[4].mxu0 %vm599_vm0, %v414_v62 }
 0x2af   : > { %734 = vmatprep.mubr.bf16.mxu0 %v2674_v1 }
 0x2b4   : > { %v597_v9 = vpop.permute.xlu0 %596 }
 0x2b5   : > { %v665_v36 = vpop.permute.xlu1 %664 }
 0x2b9   : > { %v669_v37 = vpop.permute.xlu1 %668  ;;  %v673_v40 = vpop.permute.xlu0 %672 }
 0x2bd   : > { %v677_v38 = vpop.permute.xlu1 %676 }
 0x2be   : > { %v778_v48 = vpop.permute.xlu0 %777 }
 0x2c2   : > { %v774_v39 = vpop.permute.xlu1 %773  ;;  %v782_v63 = vpop.permute.xlu0 %781 }
 0x2c7   : > { %v798_v41 = vpop.permute.xlu1 %797 }
 0x2cb   : > { %v802_v56 = vpop.permute.xlu1 %801 }
 0x381   : > { %v644_v10 = vpop.f32.mrb[4].mxu0 }
 0x382   : > { %v645_v11 = vadd.f32 %v644_v10, %v597_v9  ;;  %v646_v12 = vpop.f32.mrb[5].mxu0  ;;  %v786_v10 = vpop.permute.xlu1 %785 }
 0x383   : > { %v647_v15 = vadd.f32 %v646_v12, %v597_v9  ;;  %v648_v16 = vpop.f32.mrb[6].mxu0 }
 0x384   : > { %v653_v17 = vmul.f32 1.442695, %v645_v11  ;;  %v649_v18 = vpop.f32.mrb[7].mxu0  ;;  %vm651_vm1 = vcmp.gt.f32.partialorder %v645_v11, 0.0 }
 0x385   : > { %v655_v19 = vmul.f32 1.442695, %v647_v15  ;;  %vm652_vm2 = vcmp.gt.f32.partialorder %v647_v15, 0.0 }
 0x386   : > { %2384 = vpow2.f32 %v653_v17 }
 0x387   : > { %2386 = vpow2.f32 %v655_v19 }
 0x390   : > { %v2385_v20 = vpop.eup %2384 }
 0x391   : > { %v2387_v21 = vpop.eup %2386  ;;  %v1967_v22 = vadd.f32 -1.0, %v2385_v20 }
 0x392   : > { %v1968_v23 = vadd.f32 -1.0, %v2387_v21 }
 0x393   : > { %v659_v24 = vsel %vm651_vm1, %v645_v11, %v1967_v22 }
 0x394   : > { %v660_v25 = vsel %vm652_vm2, %v647_v15, %v1968_v23  ;;  %v661_v26 = vpack.c.bf16 %v659_v24, %v659_v24 }
 0x395   : > { %v662_v27 = vpack.c.bf16 %v660_v25, %v660_v25 }
 0x396   : > { %v697_v30 = vsel %vm603_vm15, %v661_v26, 0 }
 0x397   : > { %1971 = vmatprep.subr.msk.bf16.mxu0 %vm603_vm15, %v662_v27 }
 0x398   : > { %703 = vmatpush1.bf16.msra.mxu0 %v697_v30  ;;  %v806_v30 = vpop.permute.xlu0 %805 }
 0x39b   : > { %1972 = vmatmul.mubr.msk.bf16.vlgmr.msra.gmra.mrb[8].mxu0 %vm689_vm3, %v2332_v33 }
 0x39c   : > { %744 = vmatprep.mubr.bf16.mxu0 %v2674_v1 }
 0x3a3   : > { %1973 = vmatmul.mubr.msk.bf16.gmra.mrb[12].mxu0 %vm689_vm3, %v2333_v34 }
 0x3a4   : > { %1078 = vmatprep.mubr.bf16.mxu0 %v2674_v1 }
 0x46e   : > { %v736_v43 = vpop.f32.mrb[8].mxu0 }
 0x46f   : > { %v737_v44 = vadd.f32 %v736_v43, %v665_v36  ;;  %v738_v47 = vpop.f32.mrb[9].mxu0 }
 0x470   : > { %v739_v49 = vadd.f32 %v738_v47, %v665_v36  ;;  %v740_v50 = vpop.f32.mrb[10].mxu0 }
 0x471   : > { %v3105_v51 = vadd.f32 %v737_v44, %v3015_v7  ;;  %v741_v52 = vadd.f32 %v740_v50, %v669_v37  ;;  %v742_v54 = vpop.f32.mrb[11].mxu0 }
 0x472   : > { %v3108_v55 = vadd.f32 %v739_v49, %v3018_v8  ;;  %v743_v57 = vadd.f32 %v742_v54, %v669_v37 }
 0x473   : > { %v788_v58 = vmul.f32 %v774_v39, %v3105_v51  ;;  %v3112_v59 = vadd.f32 %v741_v52, %v3023_v13 }
 0x474   : > { %v789_v60 = vmul.f32 %v774_v39, %v3108_v55  ;;  %v3116_v61 = vadd.f32 %v743_v57, %v3026_v14  ;;  %v810_v39 = vpop.permute.xlu1 %809 }
 0x475   : > { %v790_v62 = vmul.f32 %v778_v48, %v3112_v59  ;;  %v812_v0 = vadd.f32 %v798_v41, %v788_v58 }
 0x476   : > { %v791_v6 = vmul.f32 %v778_v48, %v3116_v61  ;;  %v746_v9 = vpop.f32.mrb[12].mxu0  ;;  %v813_v11 = vadd.f32 %v798_v41, %v789_v60 }
 0x477   : > { %v814_v12 = vadd.f32 %v802_v56, %v790_v62  ;;  %v747_v15 = vadd.f32 %v746_v9, %v673_v40  ;;  %v748_v16 = vpop.f32.mrb[13].mxu0  ;;  %v828_v33 = vmul.f32 1.442695, %v812_v0  ;;  %vm820_vm7 = vcmp.gt.f32.partialorder %v812_v0, 0.0 }
 0x478   : > { %v815_v17 = vadd.f32 %v802_v56, %v791_v6  ;;  %v749_v18 = vadd.f32 %v748_v16, %v673_v40  ;;  %v750_v19 = vpop.f32.mrb[14].mxu0  ;;  %v830_v20 = vmul.f32 1.442695, %v813_v11  ;;  %vm821_vm5 = vcmp.gt.f32.partialorder %v813_v11, 0.0 }
 0x479   : > { %v832_v21 = vmul.f32 1.442695, %v814_v12  ;;  %v3121_v22 = vadd.f32 %v747_v15, %v3031_v28  ;;  %v751_v23 = vadd.f32 %v750_v19, %v677_v38  ;;  %v752_v24 = vpop.f32.mrb[15].mxu0  ;;  %vm822_vm4 = vcmp.gt.f32.partialorder %v814_v12, 0.0 }
 0x47a   : > { %v834_v25 = vmul.f32 1.442695, %v815_v17  ;;  %v3124_v26 = vadd.f32 %v749_v18, %v3034_v29  ;;  %v753_v27 = vadd.f32 %v752_v24, %v677_v38  ;;  %vm823_vm6 = vcmp.gt.f32.partialorder %v815_v17, 0.0 }
 0x47b   : > { %2388 = vpow2.f32 %v832_v21  ;;  %v792_v34 = vmul.f32 %v782_v63, %v3121_v22  ;;  %v3128_v35 = vadd.f32 %v751_v23, %v3037_v31 }
 0x47c   : > { %v3131_v36 = vadd.f32 %v753_v27, %v3040_v32  ;;  %v793_v37 = vmul.f32 %v782_v63, %v3124_v26  ;;  %2390 = vpow2.f32 %v830_v20 }
 0x47d   : > { %v794_v40 = vmul.f32 %v786_v10, %v3128_v35  ;;  %v816_v41 = vadd.f32 %v806_v30, %v792_v34  ;;  %2392 = vpow2.f32 %v834_v25 }
 0x47e   : > { %v795_v38 = vmul.f32 %v786_v10, %v3131_v36  ;;  %v817_v43 = vadd.f32 %v806_v30, %v793_v37  ;;  %2394 = vpow2.f32 %v828_v33 }
 0x47f   : > { %v836_v44 = vmul.f32 1.442695, %v816_v41  ;;  %v818_v47 = vadd.f32 %v810_v39, %v794_v40  ;;  %vm824_vm13 = vcmp.gt.f32.partialorder %v816_v41, 0.0  ;;  %v866_v40 = vpop.permute.xlu1 %865 }
 0x480   : > { %v838_v48 = vmul.f32 1.442695, %v817_v43  ;;  %v819_v49 = vadd.f32 %v810_v39, %v795_v38  ;;  %vm825_vm10 = vcmp.gt.f32.partialorder %v817_v43, 0.0  ;;  %v764_v39 = vld [vmem:[#allocation5 + $0x4] sm:$0xf] }
 0x481   : > { %2396 = vpow2.f32 %v836_v44  ;;  %v840_v50 = vmul.f32 1.442695, %v818_v47  ;;  %vm826_vm9 = vcmp.gt.f32.partialorder %v818_v47, 0.0 }
 0x482   : > { %2398 = vpow2.f32 %v838_v48  ;;  %v842_v52 = vmul.f32 1.442695, %v819_v49  ;;  %vm827_vm11 = vcmp.gt.f32.partialorder %v819_v49, 0.0 }
 0x483   : > { %2400 = vpow2.f32 %v840_v50 }
 0x484   : > { %2402 = vpow2.f32 %v842_v52 }
 0x485   : > { %v2389_v54 = vpop.eup %2388 }
 0x486   : > { %v2391_v56 = vpop.eup %2390  ;;  %v1980_v57 = vadd.f32 -1.0, %v2389_v54 }
 0x487   : > { %v2393_v58 = vpop.eup %2392  ;;  %v1979_v60 = vadd.f32 -1.0, %v2391_v56 }
 0x488   : > { %v2395_v62 = vpop.eup %2394  ;;  %v1981_v63 = vadd.f32 -1.0, %v2393_v58  ;;  %v854_v9 = vsel %vm822_vm4, %v814_v12, %v1980_v57 }
 0x489   : > { %v1978_v6 = vadd.f32 -1.0, %v2395_v62  ;;  %v853_v10 = vsel %vm821_vm5, %v813_v11, %v1979_v60  ;;  %v2296_v62 = vpack.i.bf16 %v3018_v8, %v3015_v7  ;;  %vm2692_vm5 = vmmov 0  }
 0x48a   : > { %v855_v15 = vsel %vm823_vm6, %v815_v17, %v1981_v63  ;;  %v2301_v63 = vpack.i.bf16 %v3026_v14, %v3023_v13 }
 0x48b   : > { %v2397_v16 = vpop.eup %2396  ;;  %v861_v18 = vpack.c.bf16 %v855_v15, %v853_v10  ;;  %v852_v19 = vsel %vm820_vm7, %v812_v0, %v1978_v6  ;;  %v2306_v6 = vpack.i.bf16 %v3034_v29, %v3031_v28  ;;  %v2684_v10 = vmov 13  }
 0x48c   : > { %v2399_v20 = vpop.eup %2398  ;;  %v860_v21 = vpack.c.bf16 %v854_v9, %v852_v19  ;;  %v1982_v27 = vadd.f32 -1.0, %v2397_v16  ;;  %v2311_v9 = vpack.i.bf16 %v3040_v32, %v3037_v31  ;;  %2316 = vset.pattern.permute.xlu0 %v2684_v10  ;;  %v2685_v15 = vmov 6   ;;  %v1145_v10 = vld [vmem:[#allocation10 + $0x30] sm:$0xff] }
 0x48d   : > { %v2401_v23 = vpop.eup %2400  ;;  %871 = vmatprep.subr.bf16.mxu1 %v861_v18  ;;  %v1983_v24 = vadd.f32 -1.0, %v2399_v20  ;;  %2317 = vset.pattern.permute.xlu1 %v2685_v15  ;;  %v2686_v16 = vmov 7  }
 0x48e   : > { %v2403_v25 = vpop.eup %2402  ;;  %872 = vmatpush1.bf16.msra.mxu1 %v860_v21  ;;  %v1984_v30 = vadd.f32 -1.0, %v2401_v23  ;;  %v856_v37 = vsel %vm824_vm13, %v816_v41, %v1982_v27  ;;  %v1155_v27 = vld [vmem:[#allocation10 + $0x80] sm:$0xff] }
 0x48f   : > { %v1985_v33 = vadd.f32 -1.0, %v2403_v25  ;;  %v857_v11 = vsel %vm825_vm10, %v817_v43, %v1983_v24 }
 0x490   : > { %v858_v12 = vsel %vm826_vm9, %v818_v47, %v1984_v30  ;;  %v1156_v30 = vld [vmem:[#allocation10 + $0x88] sm:$0xff] }
 0x491   : > { %v859_v17 = vsel %vm827_vm11, %v819_v49, %v1985_v33  ;;  %v862_v0 = vpack.c.bf16 %v858_v12, %v856_v37  ;;  %v1139_v37 = vld [vmem:[#allocation10] sm:$0xff] }
 0x492   : > { %v863_v34 = vpack.c.bf16 %v859_v17, %v857_v11 }
 0x494   : > { %873 = vmatprep.subr.bf16.mxu1 %v863_v34  ;;  %v2132_v34 = vpack.c.bf16 %v1156_v30, %v1155_v27  ;;  %v1167_v27 = vld [vmem:[#allocation10 + $0xe0] sm:$0xff]  ;;  %v1168_v30 = vld [vmem:[#allocation10 + $0xe8] sm:$0xff] }
 0x495   : > { %874 = vmatpush1.bf16.msra.mxu1 %v862_v0  ;;  %v1140_v0 = vld [vmem:[#allocation10 + $0x8] sm:$0xff] }
 0x498   : > { %1986 = vmatmul.mubr.msk.bf16.vlgmr.msra.gmra.mrb[0].mxu1 %vm519_vm8, %v764_v39 }
 0x499   : > { %987 = vmatprep.mubr.bf16.mxu1 %v2674_v1 }
 0x56b   : > { %v905_v38 = vpop.f32.mrb[0].mxu1 }
 0x56c   : > { %v906_v44 = vadd.f32 %v905_v38, %v866_v40  ;;  %v907_v48 = vpop.f32.mrb[1].mxu1  ;;  %v1157_v38 = vld [vmem:[#allocation10 + $0x90] sm:$0xff] }
 0x56d   : > { %v908_v50 = vadd.f32 %v907_v48, %v866_v40  ;;  %v909_v52 = vpop.f32.mrb[2].mxu1 }
 0x56e   : > { %v914_v47 = vmul.f32 1.442695, %v906_v44  ;;  %v910_v54 = vpop.f32.mrb[3].mxu1  ;;  %vm912_vm1 = vcmp.gt.f32.partialorder %v906_v44, 0.0  ;;  %v2134_v52 = vpack.c.bf16 %v1140_v0, %v1139_v37  ;;  %v1169_v37 = vld [vmem:[#allocation10 + $0xf0] sm:$0xff]  ;;  %v1170_v0 = vld [vmem:[#allocation10 + $0xf8] sm:$0xff] }
 0x56f   : > { %v916_v43 = vmul.f32 1.442695, %v908_v50  ;;  %vm913_vm2 = vcmp.gt.f32.partialorder %v908_v50, 0.0 }
 0x570   : > { %2404 = vpow2.f32 %v914_v47 }
 0x571   : > { %2406 = vpow2.f32 %v916_v43  ;;  %v1141_v43 = vld [vmem:[#allocation10 + $0x10] sm:$0xff] }
 0x57a   : > { %v2405_v41 = vpop.eup %2404 }
 0x57b   : > { %v2407_v49 = vpop.eup %2406  ;;  %v1987_v56 = vadd.f32 -1.0, %v2405_v41  ;;  %v1142_v41 = vld [vmem:[#allocation10 + $0x18] sm:$0xff] }
 0x57c   : > { %v1988_v57 = vadd.f32 -1.0, %v2407_v49  ;;  %v1159_v49 = vld [vmem:[#allocation10 + $0xa0] sm:$0xff] }
 0x57d   : > { %v920_v58 = vsel %vm912_vm1, %v906_v44, %v1987_v56  ;;  %v1158_v44 = vld [vmem:[#allocation10 + $0x98] sm:$0xff]  ;;  %v1160_v56 = vld [vmem:[#allocation10 + $0xa8] sm:$0xff] }
 0x57e   : > { %922 = vrot.lane.b32.xlu0 %v920_v58, %s2676_s12  ;;  %v921_v60 = vsel %vm913_vm2, %v908_v50, %v1988_v57  ;;  %v766_v50 = vld [vmem:[#allocation7 + $0x4] sm:$0xf]  ;;  %v2136_v54 = vpack.c.bf16 %v1158_v44, %v1157_v38  ;;  %v2138_v57 = vpack.c.bf16 %v1142_v41, %v1141_v43 }
 0x57f   : > { %924 = vrot.lane.b32.xlu1 %v921_v60, %s2676_s12 }
 0x582   : > { %930 = vrot.lane.b32.xlu0 %v920_v58, %s2678_s18 }
 0x583   : > { %932 = vrot.lane.b32.xlu1 %v921_v60, %s2678_s18 }
 0x586   : > { %2297 = vrot.lane.b32.xlu0 %v2296_v62, %s2678_s18  ;;  %v1144_v62 = vld [vmem:[#allocation10 + $0x28] sm:$0xff] }
 0x587   : > { %2302 = vrot.lane.b32.xlu1 %v2301_v63, %s2678_s18  ;;  %v1161_v63 = vld [vmem:[#allocation10 + $0xb0] sm:$0xff] }
 0x58a   : > { %2307 = vrot.lane.b32.xlu0 %v2306_v6, %s2678_s18  ;;  %v1162_v6 = vld [vmem:[#allocation10 + $0xb8] sm:$0xff] }
 0x58b   : > { %2312 = vrot.lane.b32.xlu1 %v2311_v9, %s2678_s18 }
 0x58e   : > { %943 = vperm.xlu0 %2316, %v2987_v2  }
 0x58f   : > { %1266 = vperm.xlu1 %2317, %v2987_v2  }
 0x592   : > { %2318 = vset.pattern.permute.xlu0 %v2686_v16 }
 0x593   : > { %1270 = vperm.xlu1 %2317, %v2994_v3   ;;  %1286 = vperm.xlu0 %2318, %v2987_v2  }
 0x597   : > { %2319 = vset.pattern.permute.xlu1 %v2686_v16  ;;  %2321 = vset.pattern.permute.xlu0 %v2685_v15 }
 0x598   : > { %1290 = vperm.xlu1 %2319, %v2994_v3   ;;  %1278 = vperm.xlu0 %2321, %v3006_v5  }
 0x59c   : > { %2320 = vset.pattern.permute.xlu1 %v2685_v15  ;;  %v1146_v15 = vld [vmem:[#allocation10 + $0x38] sm:$0xff] }
 0x59d   : > { %1274 = vperm.xlu1 %2320, %v2999_v4  }
 0x5a1   : > { %2322 = vset.pattern.permute.xlu1 %v2686_v16  ;;  %v1163_v16 = vld [vmem:[#allocation10 + $0xc0] sm:$0xff] }
 0x5a2   : > { %1294 = vperm.xlu1 %2322, %v2999_v4  }
 0x5a6   : > { %1298 = vperm.xlu1 %2322, %v3006_v5  }
 0x5f0   : > { %v923_v18 = vpop.permute.xlu0 %922 }
 0x5f1   : > { %v925_v19 = vpop.permute.xlu1 %924 }
 0x5f2   : > { %v926_v20 = vsel %vm578_vm12, %v923_v18, %v925_v19  ;;  %v927_v2 = vsel %vm578_vm12, %v925_v19, %v923_v18  ;;  %v1164_v18 = vld [vmem:[#allocation10 + $0xc8] sm:$0xff]  ;;  %v2146_v19 = vpack.c.bf16 %v1146_v15, %v1145_v10 }
 0x5f3   : > { %v928_v3 = vmul.f32 %v3059_v46, %v927_v2  ;;  %v939_v21 = vpack.c.bf16 %v921_v60, %v926_v20  ;;  %v1143_v60 = vld [vmem:[#allocation10 + $0x20] sm:$0xff]  ;;  %v2148_v20 = vpack.c.bf16 %v1164_v18, %v1163_v16  ;;  %v2688_v16 = vmov 8  }
 0x5f4   : > { %v931_v23 = vpop.permute.xlu0 %930  ;;  %v2142_v9 = vpack.c.bf16 %v1144_v62, %v1143_v60  ;;  %v1147_v2 = vld [vmem:[#allocation10 + $0x40] sm:$0xff]  ;;  %2325 = vset.pattern.permute.xlu1 %v2688_v16  ;;  %v2690_v18 = vmov 9  }
 0x5f5   : > { %v938_v24 = vpack.c.bf16 %v920_v58, %v928_v3  ;;  %v933_v25 = vpop.permute.xlu1 %932  ;;  %955 = vmatprep.subr.bf16.mxu1 %v939_v21  ;;  %v2140_v58 = vpack.c.bf16 %v1160_v56, %v1159_v49  ;;  %v1148_v3 = vld [vmem:[#allocation10 + $0x48] sm:$0xff]  ;;  %v1165_v21 = vld [vmem:[#allocation10 + $0xd0] sm:$0xff] }
 0x5f6   : > { %v934_v4 = vsel %vm410_vm14, %v931_v23, %v933_v25  ;;  %v935_v5 = vsel %vm410_vm14, %v933_v25, %v931_v23  ;;  %v1166_v23 = vld [vmem:[#allocation10 + $0xd8] sm:$0xff] }
 0x5f7   : > { %v937_v33 = vmul.f32 %v3068_v53, %v935_v5  ;;  %v940_v12 = vpack.c.bf16 %v934_v4, %v934_v4  ;;  %956 = vmatpush1.bf16.msra.mxu1 %v938_v24  ;;  %v2150_v24 = vpack.c.bf16 %v1148_v3, %v1147_v2  ;;  %v2152_v25 = vpack.c.bf16 %v1166_v23, %v1165_v21  ;;  %v1149_v4 = vld [vmem:[#allocation10 + $0x50] sm:$0xff]  ;;  %v1150_v5 = vld [vmem:[#allocation10 + $0x58] sm:$0xff] }
 0x5f8   : > { %v3173_v11 = vpop.permute.xlu0 %2297  ;;  %v3238_v2 = vld [vmem:[%s3453_s1 + $0x18] sm:$0xff] }
 0x5f9   : > { %v941_v17 = vpack.c.bf16 %v937_v33, %v937_v33  ;;  %v2300_v39 = vunpack.i.h.bf16 %v3173_v11  ;;  %v2299_v40 = vunpack.i.l.bf16 %v3173_v11  ;;  %v950_v48 = vsel %vm603_vm15, %v940_v12, 0  ;;  %v2303_v38 = vpop.permute.xlu1 %2302 }
 0x5fa   : > { %v2154_v33 = vpack.c.bf16 %v1150_v5, %v1149_v4  ;;  %v2156_v12 = vpack.c.bf16 %v1168_v30, %v1167_v27 }
 0x5fb   : > { %1989 = vmatprep.subr.msk.bf16.mxu1 %vm603_vm15, %v941_v17  ;;  %v1127_v53 = vsel %vm410_vm14, %v2300_v39, %v2299_v40  ;;  %v1151_v17 = vld [vmem:[#allocation10 + $0x60] sm:$0xff]  ;;  %v1123_v43 = vsel %vm410_vm14, %v2299_v40, %v2300_v39 }
 0x5fc   : > { %958 = vmatpush1.bf16.msra.mxu1 %v950_v48  ;;  %v1132_v47 = vmax.f32 %v3018_v8, %v1127_v53  ;;  %v2144_v8 = vpack.c.bf16 %v1162_v6, %v1161_v63  ;;  %v2160_v48 = vpack.c.bf16 %v1170_v0, %v1169_v37  ;;  %v2305_v53 = vunpack.i.h.bf16 %v2303_v38 }
 0x5fd   : > { %2133 = vmatprep.subr.bf16.mxu1 %v2132_v34  ;;  %v1152_v34 = vld [vmem:[#allocation10 + $0x68] sm:$0xff]  ;;  %v1131_v60 = vmax.f32 %v3015_v7, %v1123_v43 }
 0x5fe   : > { %v2158_v44 = vpack.c.bf16 %v1152_v34, %v1151_v17 }
 0x5ff   : > { %1990 = vmatmul.mubr.msk.bf16.vlgmr.msra.gmra.mrb[4].mxu1 %vm599_vm0, %v766_v50  ;;  %v2304_v50 = vunpack.i.l.bf16 %v2303_v38 }
 0x600   : > { %2135 = vmatpush3.bf16.msra.mxu1 %v2134_v52  ;;  %1235 = vmatprep.mubr.f32.mxu1 %v1132_v47  ;;  %v1153_v52 = vld [vmem:[#allocation10 + $0x70] sm:$0xff]  ;;  %v1154_v47 = vld [vmem:[#allocation10 + $0x78] sm:$0xff] }
 0x601   : > { %2137 = vmatprep.subr.bf16.mxu1 %v2136_v54  ;;  %v2308_v54 = vpop.permute.xlu0 %2307  ;;  %v2162_v41 = vpack.c.bf16 %v1154_v47, %v1153_v52  ;;  %v1124_v63 = vsel %vm410_vm14, %v2304_v50, %v2305_v53  ;;  %v2335_v47 = vld [vmem:[%s3456_s4 + $0x18] sm:$0xff]  }
 0x602   : > { %v2310_v49 = vunpack.i.h.bf16 %v2308_v54  ;;  %v2309_v56 = vunpack.i.l.bf16 %v2308_v54  ;;  %v1133_v40 = vmax.f32 %v3023_v13, %v1124_v63 }
 0x604   : > { %2139 = vmatpush3.bf16.msra.mxu1 %v2138_v57  ;;  %v1128_v57 = vsel %vm410_vm14, %v2305_v53, %v2304_v50  ;;  %v1129_v39 = vsel %vm410_vm14, %v2310_v49, %v2309_v56  ;;  %v1125_v7 = vsel %vm410_vm14, %v2309_v56, %v2310_v49  ;;  %v2334_v50 = vld [vmem:[%s3456_s4 + $0x10] sm:$0xff]  }
 0x605   : > { %2141 = vmatprep.subr.bf16.mxu1 %v2140_v58  ;;  %v2313_v58 = vpop.permute.xlu1 %2312  ;;  %v1134_v62 = vmax.f32 %v3026_v14, %v1128_v57 }
 0x606   : > { %v2315_v11 = vunpack.i.h.bf16 %v2313_v58  ;;  %v2314_v6 = vunpack.i.l.bf16 %v2313_v58 }
 0x608   : > { %2143 = vmatpush3.bf16.msra.mxu1 %v2142_v9  ;;  %v1136_v9 = vmax.f32 %v3034_v29, %v1129_v39  ;;  %v1130_v14 = vsel %vm410_vm14, %v2315_v11, %v2314_v6  ;;  %v1126_v15 = vsel %vm410_vm14, %v2314_v6, %v2315_v11  ;;  %v2687_v29 = vmov 14  }
 0x609   : > { %2145 = vmatprep.subr.bf16.mxu1 %v2144_v8  ;;  %v1135_v8 = vmax.f32 %v3031_v28, %v1125_v7  ;;  %v1138_v10 = vmax.f32 %v3040_v32, %v1130_v14  ;;  %v1137_v13 = vmax.f32 %v3037_v31, %v1126_v15  ;;  %2323 = vset.pattern.permute.xlu0 %v2687_v29  ;;  %v3216_v28 = vld [vmem:[%s3453_s1] sm:$0xff]  ;;  %v2689_v32 = vmov 15   ;;  %v3223_v31 = vld [vmem:[%s3453_s1 + $0x10] sm:$0xff] }
 0x60a   : > { %1328 = vperm.xlu0 %2323, %v3216_v28  }
 0x60c   : > { %2147 = vmatpush3.bf16.msra.mxu1 %v2146_v19  ;;  %v3230_v19 = vld [vmem:[%s3453_s1 + $0x8] sm:$0xff] }
 0x60d   : > { %2149 = vmatprep.subr.bf16.mxu1 %v2148_v20  ;;  %v2691_v20 = vmov 5   ;;  %v944_v3 = vpop.permute.xlu0 %943 }
 0x60e   : > { %2324 = vset.pattern.permute.xlu0 %v2689_v32 }
 0x60f   : > { %1388 = vperm.xlu0 %2324, %v3216_v28  }
 0x610   : > { %2151 = vmatpush3.bf16.msra.mxu1 %v2150_v24 }
 0x611   : > { %2153 = vmatprep.subr.bf16.mxu1 %v2152_v25 }
 0x612   : > { %v1287_v56 = vpop.permute.xlu0 %1286 }
 0x613   : > { %2326 = vset.pattern.permute.xlu0 %v2688_v16 }
 0x614   : > { %2155 = vmatpush3.bf16.msra.mxu1 %v2154_v33  ;;  %1452 = vperm.xlu0 %2326, %v3223_v31  }
 0x615   : > { %2157 = vmatprep.subr.bf16.mxu1 %v2156_v12 }
 0x617   : > { %v1279_v16 = vpop.permute.xlu0 %1278 }
 0x618   : > { %2159 = vmatpush3.bf16.msra.mxu1 %v2158_v44  ;;  %2328 = vset.pattern.permute.xlu0 %v2690_v18 }
 0x619   : > { %2161 = vmatprep.subr.bf16.mxu1 %v2160_v48  ;;  %1542 = vperm.xlu0 %2328, %v3230_v19   ;;  %v1267_v48 = vpop.permute.xlu1 %1266 }
 0x61c   : > { %2163 = vmatpush3.bf16.msra.mxu1 %v2162_v41 }
 0x61d   : > { %2329 = vset.pattern.permute.xlu0 %v2691_v20  ;;  %v1271_v52 = vpop.permute.xlu1 %1270 }
 0x61e   : > { %1009 = vperm.xlu0 %2329, %v3216_v28  }
 0x61f   : > { %1236 = vmatmul.mubr.f32.vlgmr.msra.gmra.mrb[8].mxu1 %v1131_v60 }
 0x620   : > { %1240 = vmatprep.mubr.f32.mxu1 %v1134_v62 }
 0x621   : > { %v1291_v54 = vpop.permute.xlu1 %1290 }
 0x622   : > { %1021 = vperm.xlu0 %2329, %v3238_v2  }
 0x623   : > { %1241 = vmatmul.mubr.f32.gmra.mrb[10].mxu1 %v1133_v40 }
 0x624   : > { %1245 = vmatprep.mubr.f32.mxu1 %v1136_v9 }
 0x625   : > { %v1275_v60 = vpop.permute.xlu1 %1274 }
 0x626   : > { %2331 = vset.pattern.permute.xlu0 %v2690_v18 }
 0x627   : > { %1246 = vmatmul.mubr.f32.gmra.mrb[12].mxu1 %v1135_v8 }
 0x628   : > { %1250 = vmatprep.mubr.f32.mxu1 %v1138_v10 }
 0x629   : > { %v1295_v8 = vpop.permute.xlu1 %1294 }
 0x62b   : > { %1251 = vmatmul.mubr.f32.gmra.mrb[14].mxu1 %v1137_v13 }
 0x62c   : > { %1772 = vmatprep.mubr.bf16.mxu1 %v2674_v1 }
 0x6d2   : > { %v989_v21 = vpop.f32.mrb[4].mxu1 }
 0x6d3   : > { %v990_v23 = vadd.f32 %v989_v21, %v944_v3  ;;  %v991_v24 = vpop.f32.mrb[5].mxu1 }
 0x6d4   : > { %v992_v25 = vadd.f32 %v991_v24, %v944_v3  ;;  %v993_v4 = vpop.f32.mrb[6].mxu1  ;;  %v1299_v24 = vpop.permute.xlu1 %1298 }
 0x6d5   : > { %v998_v5 = vmul.f32 1.442695, %v990_v23  ;;  %v994_v27 = vpop.f32.mrb[7].mxu1  ;;  %vm996_vm12 = vcmp.gt.f32.partialorder %v990_v23, 0.0 }
 0x6d6   : > { %v1000_v30 = vmul.f32 1.442695, %v992_v25  ;;  %vm997_vm4 = vcmp.gt.f32.partialorder %v992_v25, 0.0 }
 0x6d7   : > { %2408 = vpow2.f32 %v998_v5 }
 0x6d8   : > { %2410 = vpow2.f32 %v1000_v30 }
 0x6e1   : > { %v2409_v33 = vpop.eup %2408 }
 0x6e2   : > { %v2411_v12 = vpop.eup %2410  ;;  %v1991_v17 = vadd.f32 -1.0, %v2409_v33 }
 0x6e3   : > { %v1992_v34 = vadd.f32 -1.0, %v2411_v12 }
 0x6e4   : > { %v1004_v37 = vsel %vm996_vm12, %v990_v23, %v1991_v17 }
 0x6e5   : > { %v1005_v0 = vsel %vm997_vm4, %v992_v25, %v1992_v34  ;;  %v1006_v38 = vpack.c.bf16 %v1004_v37, %v1004_v37 }
 0x6e6   : > { %v1007_v44 = vpack.c.bf16 %v1005_v0, %v1005_v0 }
 0x6e7   : > { %v1041_v53 = vsel %vm603_vm15, %v1006_v38, 0 }
 0x6e8   : > { %1995 = vmatprep.subr.msk.bf16.mxu0 %vm603_vm15, %v1007_v44 }
 0x6e9   : > { %1047 = vmatpush1.bf16.msra.mxu0 %v1041_v53 }
 0x6ea   : > { %2102 = vmatprep.subr.bf16.mxu0 %v2679_v45 }
 0x6ec   : > { %1996 = vmatmul.mubr.msk.bf16.vlgmr.msra.gmra.mrb[16].mxu0 %vm689_vm3, %v2334_v50 }
 0x6ed   : > { %1088 = vmatprep.mubr.bf16.mxu0 %v2674_v1 }
 0x6f2   : > { %v2077_v43 = vpop.f32.mrb[8].mxu1 }
 0x6f3   : > { %v2078_v41 = vpop.f32.mrb[9].mxu1 }
 0x6f4   : > { %v3253_v49 = vadd.f32 %v2078_v41, %v2077_v43  ;;  %1997 = vmatmul.mubr.msk.bf16.gmra.mrb[20].mxu0 %vm689_vm3, %v2335_v47 }
 0x6f5   : > { %2106 = vmatprep.mubr.msk.bf16.mxu0 %vm2692_vm5, %v2679_v45 }
 0x6f6   : > { %v2080_v57 = vpop.f32.mrb[10].mxu1  ;;  %v1281_v58 = vmul.f32 %v3253_v49, %v1267_v48 }
 0x6f7   : > { %v2081_v62 = vpop.f32.mrb[11].mxu1 }
 0x6f8   : > { %v1301_v63 = vadd.f32 %v1287_v56, %v1281_v58  ;;  %v3259_v11 = vadd.f32 %v2081_v62, %v2080_v57  ;;  %v1329_v62 = vpop.permute.xlu0 %1328 }
 0x6fa   : > { %v1309_v6 = vmul.f32 1.442695, %v1301_v63  ;;  %v1282_v39 = vmul.f32 %v3259_v11, %v1271_v52  ;;  %v2083_v40 = vpop.f32.mrb[12].mxu1  ;;  %vm1305_vm6 = vcmp.gt.f32.partialorder %v1301_v63, 0.0  ;;  %v1257_v52 = vld [vmem:[#allocation5 + $0x8] sm:$0xf] }
 0x6fb   : > { %v2084_v9 = vpop.f32.mrb[13].mxu1 }
 0x6fc   : > { %2412 = vpow2.f32 %v1309_v6  ;;  %v1302_v7 = vadd.f32 %v1291_v54, %v1282_v39  ;;  %v3262_v14 = vadd.f32 %v2084_v9, %v2083_v40  ;;  %v1389_v42 = vpop.permute.xlu0 %1388 }
 0x6fe   : > { %v1311_v10 = vmul.f32 1.442695, %v1302_v7  ;;  %v1283_v15 = vmul.f32 %v3262_v14, %v1275_v60  ;;  %v2086_v13 = vpop.f32.mrb[14].mxu1  ;;  %vm1306_vm7 = vcmp.gt.f32.partialorder %v1302_v7, 0.0 }
 0x6ff   : > { %v2087_v29 = vpop.f32.mrb[15].mxu1 }
 0x700   : > { %2414 = vpow2.f32 %v1311_v10  ;;  %v1303_v32 = vadd.f32 %v1295_v8, %v1283_v15  ;;  %v3265_v3 = vadd.f32 %v2087_v29, %v2086_v13 }
 0x702   : > { %v1313_v21 = vmul.f32 1.442695, %v1303_v32  ;;  %v1284_v23 = vmul.f32 %v3265_v3, %v1279_v16  ;;  %vm1307_vm9 = vcmp.gt.f32.partialorder %v1303_v32, 0.0  ;;  %v1953_v16 = vsel %vm410_vm14, 1.0, %v2679_v45 }
 0x704   : > { %2416 = vpow2.f32 %v1313_v21  ;;  %v1304_v25 = vadd.f32 %v1299_v24, %v1284_v23 }
 0x706   : > { %v2413_v4 = vpop.eup %2412  ;;  %v1315_v5 = vmul.f32 1.442695, %v1304_v25  ;;  %vm1308_vm10 = vcmp.gt.f32.partialorder %v1304_v25, 0.0 }
 0x707   : > { %v2002_v27 = vadd.f32 -1.0, %v2413_v4 }
 0x708   : > { %2418 = vpow2.f32 %v1315_v5 }
 0x709   : > { %v1321_v12 = vsel %vm1305_vm6, %v1301_v63, %v2002_v27 }
 0x70a   : > { %v2415_v30 = vpop.eup %2414 }
 0x70b   : > { %v2003_v33 = vadd.f32 -1.0, %v2415_v30 }
 0x70d   : > { %v1322_v17 = vsel %vm1306_vm7, %v1302_v7, %v2003_v33 }
 0x70e   : > { %v2417_v34 = vpop.eup %2416  ;;  %v1325_v37 = vpack.c.bf16 %v1322_v17, %v1321_v12  ;;  %v2337_v12 = vld [vmem:[%s3456_s4 + $0x28] sm:$0xff]   ;;  %v2338_v17 = vld [vmem:[#allocation8] sm:$0xff]  }
 0x70f   : > { %v2004_v0 = vadd.f32 -1.0, %v2417_v34 }
 0x710   : > { %2103 = vmatpush3.bf16.msra.mxu0 %v1325_v37 }
 0x711   : > { %2104 = vmatprep.subr.bf16.mxu0 %v2679_v45  ;;  %v1323_v53 = vsel %vm1307_vm9, %v1303_v32, %v2004_v0  ;;  %v1453_v0 = vpop.permute.xlu0 %1452 }
 0x712   : > { %v2419_v38 = vpop.eup %2418 }
 0x713   : > { %v2005_v44 = vadd.f32 -1.0, %v2419_v38 }
 0x715   : > { %v1324_v48 = vsel %vm1308_vm10, %v1304_v25, %v2005_v44 }
 0x716   : > { %v1326_v50 = vpack.c.bf16 %v1324_v48, %v1323_v53 }
 0x718   : > { %2105 = vmatpush3.bf16.msra.mxu0 %v1326_v50 }
 0x719   : > { %2110 = vmatprep.subr.bf16.mxu0 %v2679_v45 }
 0x71b   : > { %2107 = vmatmul.mubr.msk.bf16.vlgmr.msra.gmra.mrb[24].mxu0 %vm519_vm8, %v1257_v52 }
 0x71c   : > { %2114 = vmatprep.mubr.msk.bf16.mxu0 %vm2692_vm5, %v2679_v45 }
 0x7bf   : > { %v3273_v47 = vpop.f32.mrb[16].mxu0 }
 0x7c0   : > { %v3275_v54 = vpop.f32.mrb[17].mxu0 }
 0x7c1   : > { %v3277_v43 = vpop.f32.mrb[18].mxu0 }
 0x7c2   : > { %v3279_v41 = vpop.f32.mrb[19].mxu0 }
 0x7c7   : > { %v3281_v56 = vpop.f32.mrb[20].mxu0 }
 0x7c8   : > { %v3283_v57 = vpop.f32.mrb[21].mxu0 }
 0x7c9   : > { %v3285_v58 = vpop.f32.mrb[22].mxu0 }
 0x7ca   : > { %v3287_v60 = vpop.f32.mrb[23].mxu0 }
 0x7ee   : > { %v1368_v63 = vpop.f32.mrb[24].mxu0 }
 0x7ef   : > { %v1369_v6 = vadd.f32 %v1368_v63, %v1329_v62  ;;  %v2108_v39 = vpop.f32.mrb[25].mxu0 }
 0x7f0   : > { %v1371_v40 = vpop.f32.mrb[26].mxu0 }
 0x7f1   : > { %v1375_v9 = vmul.f32 1.442695, %v1369_v6  ;;  %v2109_v7 = vpop.f32.mrb[27].mxu0  ;;  %vm1374_vm11 = vcmp.gt.f32.partialorder %v1369_v6, 0.0 }
 0x7f3   : > { %2420 = vpow2.f32 %v1375_v9 }
 0x7fd   : > { %v2421_v8 = vpop.eup %2420 }
 0x7fe   : > { %v2007_v10 = vadd.f32 -1.0, %v2421_v8 }
 0x800   : > { %v1378_v15 = vsel %vm1374_vm11, %v1369_v6, %v2007_v10 }
 0x801   : > { %1379 = vrot.lane.b32.xlu1 %v1378_v15, %s2676_s12  ;;  %s3405_s12 = scalar_lea.hbm %s3460_s8, %s2044_s11 }
 0x805   : > { %1382 = vrot.lane.b32.xlu1 %v1378_v15, %s2678_s18  ;;  %s1810_s18 = scalar_lea.sflag [#allocation4], %s2961_s10 }
 0x809   : > { %1444 = vperm.xlu1 %2325, %v3216_v28  }
 0x80d   : > { %1448 = vperm.xlu1 %2325, %v3230_v19  }
 0x811   : > { %1456 = vperm.xlu1 %2325, %v3238_v2  }
 0x815   : > { %2327 = vset.pattern.permute.xlu1 %v2690_v18 }
 0x816   : > { %1538 = vperm.xlu1 %2327, %v3216_v28  }
 0x81a   : > { %1546 = vperm.xlu1 %2327, %v3223_v31  }
 0x81e   : > { %1550 = vperm.xlu1 %2327, %v3238_v2  }
 0x822   : > { %2330 = vset.pattern.permute.xlu1 %v2691_v20 }
 0x823   : > { %1013 = vperm.xlu1 %2330, %v3230_v19   ;;  %v1259_v19 = vld [vmem:[#allocation7 + $0x8] sm:$0xf] }
 0x827   : > { %1017 = vperm.xlu1 %2330, %v3223_v31  }
 0x873   : > { %v1380_v13 = vpop.permute.xlu1 %1379 }
 0x874   : > { %v1381_v29 = vmul.f32 %v3059_v46, %v1380_v13  ;;  %v2336_v46 = vld [vmem:[%s3456_s4 + $0x20] sm:$0xff]  }
 0x875   : > { %v2342_v13 = vld [vmem:[%s3459_s7 + $0x4] ss:$8 sps:$4 sm:$0xff]  }
 0x876   : > { %v1385_v18 = vpack.c.bf16 %v1378_v15, %v1381_v29  ;;  %v2339_v15 = vld [vmem:[#allocation8 + $0x8] sm:$0xff]   ;;  %1740 = vmatprep.subr.bf16.mxu1 %v2342_v13 }
 0x877   : > { %v1383_v32 = vpop.permute.xlu1 %1382  ;;  %v2346_v29 = vld [vmem:[%s3459_s7 + $0x20] ss:$8 sps:$4 sm:$0xff]  }
 0x878   : > { %v1384_v28 = vmul.f32 %v1953_v16, %v1383_v32  ;;  %2111 = vmatpush3.bf16.msra.mxu0 %v1385_v18  ;;  %v2351_v16 = vld [vmem:[%s3459_s7 + $0x34] ss:$8 sps:$4 sm:$0xff]   ;;  %v2349_v18 = vld [vmem:[%s3459_s7 + $0x30] ss:$8 sps:$4 sm:$0xff]   ;;  %v2352_v32 = vld [vmem:[%s3459_s7 + $0x40] ss:$8 sps:$4 sm:$0xff]  }
 0x879   : > { %2112 = vmatprep.subr.bf16.mxu0 %v2679_v45 }
 0x87a   : > { %v1386_v2 = vpack.c.bf16 %v1384_v28, %v1384_v28  ;;  %v2354_v28 = vld [vmem:[%s3459_s7 + $0x44] ss:$8 sps:$4 sm:$0xff]  }
 0x87c   : > { %v1395_v20 = vsel %vm603_vm15, %v1386_v2, 0  ;;  %v2357_v2 = vld [vmem:[%s3459_s7 + $0x54] ss:$8 sps:$4 sm:$0xff]  }
 0x87d   : > { %2113 = vmatpush3.bf16.msra.mxu0 %v1395_v20  ;;  %v2355_v20 = vld [vmem:[%s3459_s7 + $0x50] ss:$8 sps:$4 sm:$0xff]  }
 0x880   : > { %2115 = vmatmul.mubr.msk.bf16.vlgmr.msra.gmra.mrb[28].mxu0 %vm599_vm0, %v1259_v19  ;;  %v2360_v19 = vld [vmem:[%s3459_s7 + $0x64] ss:$8 sps:$4 sm:$0xff]  }
 0x881   : > { %2120 = vmatprep.mubr.msk.bf16.mxu0 %vm689_vm3, %v2336_v46  ;;  %v2358_v46 = vld [vmem:[%s3459_s7 + $0x60] ss:$8 sps:$4 sm:$0xff]  }
 0x888   : > { %v1445_v34 = vpop.permute.xlu1 %1444 }
 0x88c   : > { %v1449_v37 = vpop.permute.xlu1 %1448 }
 0x890   : > { %v1457_v53 = vpop.permute.xlu1 %1456 }
 0x953   : > { %v1431_v31 = vpop.f32.mrb[28].mxu0 }
 0x954   : > { %v1432_v21 = vadd.f32 %v1431_v31, %v1389_v42  ;;  %v2116_v23 = vpop.f32.mrb[29].mxu0  ;;  %v2363_v42 = vld [vmem:[%s3459_s7 + $0x74] ss:$8 sps:$4 sm:$0xff]   ;;  %v2361_v31 = vld [vmem:[%s3459_s7 + $0x70] ss:$8 sps:$4 sm:$0xff]  }
 0x955   : > { %v1434_v24 = vpop.f32.mrb[30].mxu0 }
 0x956   : > { %v1438_v25 = vmul.f32 1.442695, %v1432_v21  ;;  %v2117_v45 = vpop.f32.mrb[31].mxu0  ;;  %vm1437_vm14 = vcmp.gt.f32.partialorder %v1432_v21, 0.0 }
 0x958   : > { %2422 = vpow2.f32 %v1438_v25 }
 0x962   : > { %v2423_v4 = vpop.eup %2422 }
 0x963   : > { %v2009_v5 = vadd.f32 -1.0, %v2423_v4 }
 0x965   : > { %v1441_v27 = vsel %vm1437_vm14, %v1432_v21, %v2009_v5  ;;  %v1539_v21 = vpop.permute.xlu1 %1538 }
 0x966   : > { %v1442_v30 = vpack.c.bf16 %v1441_v27, %v1441_v27 }
 0x968   : > { %2164 = vmatprep.subr.msk.bf16.mxu0 %vm603_vm15, %v1442_v30  ;;  %v1476_v33 = vsel %vm603_vm15, %v1442_v30, 0  ;;  %v1543_v30 = vpop.permute.xlu0 %1542 }
 0x969   : > { %2119 = vmatpush3.bf16.msra.mxu0 %v1476_v33  ;;  %v1547_v23 = vpop.permute.xlu1 %1546 }
 0x96c   : > { %2121 = vmatmul.mubr.msk.bf16.vlgmr.msra.gmra.mrb[32].mxu0 %vm689_vm3, %v2337_v12 }
 0x96d   : > { %2128 = vmatprep.mubr.msk.bf16.mxu0 %vm519_vm8, %v2338_v17  ;;  %v1551_v4 = vpop.permute.xlu1 %1550 }
 0x971   : > { %v1014_v13 = vpop.permute.xlu1 %1013 }
 0xa3f   : > { %v2122_v38 = vpop.f32.mrb[32].mxu0 }
 0xa40   : > { %v1521_v44 = vadd.f32 %v2122_v38, %v1453_v0  ;;  %v1512_v48 = vpop.f32.mrb[33].mxu0 }
 0xa41   : > { %v1513_v50 = vadd.f32 %v1512_v48, %v1445_v34  ;;  %v2123_v52 = vpop.f32.mrb[34].mxu0 }
 0xa42   : > { %v1524_v62 = vadd.f32 %v2123_v52, %v1457_v53  ;;  %v1515_v63 = vpop.f32.mrb[35].mxu0  ;;  %v1529_v39 = vadd.f32 %v3262_v14, %v1521_v44  ;;  %v2340_v14 = vld [vmem:[%s3459_s7] ss:$8 sps:$4 sm:$0xff]  }
 0xa43   : > { %v1516_v6 = vadd.f32 %v1515_v63, %v1449_v37  ;;  %v1527_v9 = vadd.f32 %v3253_v49, %v1513_v50  ;;  %1741 = vmatpush1.bf16.msra.mxu1 %v2340_v14  ;;  %v2345_v49 = vld [vmem:[%s3459_s7 + $0x14] ss:$8 sps:$4 sm:$0xff]  }
 0xa44   : > { %v1530_v40 = vadd.f32 %v3265_v3, %v1524_v62  ;;  %1742 = vmatprep.subr.bf16.mxu1 %v2345_v49  ;;  %v2348_v3 = vld [vmem:[%s3459_s7 + $0x24] ss:$8 sps:$4 sm:$0xff]  }
 0xa45   : > { %v1528_v7 = vadd.f32 %v3259_v11, %v1516_v6  ;;  %v2343_v11 = vld [vmem:[%s3459_s7 + $0x10] ss:$8 sps:$4 sm:$0xff]  }
 0xa46   : > { %v1536_v8 = vpack.c.bf16 %v1530_v40, %v1529_v39 }
 0xa47   : > { %v1535_v10 = vpack.c.bf16 %v1528_v7, %v1527_v9  ;;  %1743 = vmatpush1.bf16.msra.mxu1 %v2343_v11  ;;  %v1085_v11 = vadd.f32 %v3277_v43, %v1014_v13 }
 0xa48   : > { %1744 = vmatprep.subr.bf16.mxu1 %v2348_v3  ;;  %v1087_v3 = vadd.f32 %v3279_v41, %v1014_v13 }
 0xa49   : > { %2124 = vmatprep.subr.bf16.mxu0 %v1535_v10 }
 0xa4a   : > { %2125 = vmatpush3.bf16.msra.mxu0 %v1535_v10  ;;  %v1102_v43 = vadd.f32 %v1087_v3, %v3116_v61 }
 0xa4b   : > { %2126 = vmatprep.subr.bf16.mxu0 %v1536_v8  ;;  %1745 = vmatpush1.bf16.msra.mxu1 %v2346_v29 }
 0xa4c   : > { %1746 = vmatprep.subr.bf16.mxu1 %v2351_v16 }
 0xa4e   : > { %2127 = vmatpush3.bf16.msra.mxu0 %v1536_v8 }
 0xa4f   : > { %1747 = vmatpush1.bf16.msra.mxu1 %v2349_v18 }
 0xa50   : > { %1748 = vmatprep.subr.bf16.mxu1 %v2354_v28 }
 0xa51   : > { %2129 = vmatmul.mubr.msk.bf16.vlgmr.msra.gmra.mrb[36].mxu0 %vm519_vm8, %v2339_v15  ;;  %v1010_v15 = vpop.permute.xlu0 %1009 }
 0xa52   : > { %v1081_v14 = vadd.f32 %v3273_v47, %v1010_v15  ;;  %v1083_v49 = vadd.f32 %v3275_v54, %v1010_v15 }
 0xa53   : > { %1749 = vmatpush1.bf16.msra.mxu1 %v2352_v32 }
 0xa54   : > { %1750 = vmatprep.subr.bf16.mxu1 %v2357_v2  ;;  %v1099_v16 = vadd.f32 %v1081_v14, %v3105_v51  ;;  %v1100_v28 = vadd.f32 %v1083_v49, %v3108_v55 }
 0xa57   : > { %1751 = vmatpush1.bf16.msra.mxu1 %v2355_v20 }
 0xa58   : > { %1752 = vmatprep.subr.bf16.mxu1 %v2360_v19  ;;  %v1101_v19 = vadd.f32 %v1085_v11, %v3112_v59 }
 0xa5b   : > { %1753 = vmatpush1.bf16.msra.mxu1 %v2358_v46 }
 0xa5c   : > { %1754 = vmatprep.subr.bf16.mxu1 %v2363_v42  ;;  %v1022_v42 = vpop.permute.xlu0 %1021 }
 0xa5d   : > { %v1095_v61 = vadd.f32 %v3285_v58, %v1022_v42 }
 0xa5f   : > { %1755 = vmatpush1.bf16.msra.mxu1 %v2361_v31  ;;  %v1105_v58 = vadd.f32 %v1095_v61, %v3128_v35 }
 0xb24   : > { %v2130_v24 = vpop.f32.mrb[36].mxu0 }
 0xb25   : > { %v1612_v25 = vadd.f32 %v2130_v24, %v1547_v23  ;;  %v1603_v45 = vpop.f32.mrb[37].mxu0 }
 0xb26   : > { %v1604_v5 = vadd.f32 %v1603_v45, %v1539_v21  ;;  %v2131_v27 = vpop.f32.mrb[38].mxu0 }
 0xb27   : > { %v2020_v33 = vmul.f32 -1.442695, %v1612_v25  ;;  %v1615_v12 = vadd.f32 %v2131_v27, %v1551_v4  ;;  %v1606_v17 = vpop.f32.mrb[39].mxu0 }
 0xb28   : > { %v2018_v34 = vmul.f32 -1.442695, %v1604_v5  ;;  %v1607_v37 = vadd.f32 %v1606_v17, %v1543_v30 }
 0xb29   : > { %2424 = vpow2.f32 %v2020_v33  ;;  %v2021_v0 = vmul.f32 -1.442695, %v1615_v12 }
 0xb2a   : > { %2426 = vpow2.f32 %v2018_v34  ;;  %v2019_v38 = vmul.f32 -1.442695, %v1607_v37 }
 0xb2b   : > { %2428 = vpow2.f32 %v2021_v0 }
 0xb2c   : > { %2430 = vpow2.f32 %v2019_v38 }
 0xb33   : > { %v2425_v44 = vpop.eup %2424 }
 0xb34   : > { %v2427_v48 = vpop.eup %2426  ;;  %v1632_v53 = vadd.f32 1.0, %v2425_v44 }
 0xb35   : > { %v2429_v50 = vpop.eup %2428  ;;  %v1630_v52 = vadd.f32 1.0, %v2427_v48 }
 0xb36   : > { %v2431_v62 = vpop.eup %2430  ;;  %2432 = vrcp.f32 %v1632_v53  ;;  %v1633_v63 = vadd.f32 1.0, %v2429_v50 }
 0xb37   : > { %2434 = vrcp.f32 %v1630_v52  ;;  %v1631_v6 = vadd.f32 1.0, %v2431_v62 }
 0xb38   : > { %2436 = vrcp.f32 %v1633_v63 }
 0xb39   : > { %2438 = vrcp.f32 %v1631_v6 }
 0xb40   : > { %v2433_v39 = vpop.eup %2432 }
 0xb41   : > { %v2435_v40 = vpop.eup %2434 }
 0xb42   : > { %v2437_v9 = vpop.eup %2436 }
 0xb43   : > { %v2439_v7 = vpop.eup %2438  ;;  %v1659_v8 = vpack.c.bf16 %v2437_v9, %v2433_v39 }
 0xb44   : > { %v1658_v10 = vpack.c.bf16 %v2439_v7, %v2435_v40 }
 0xb46   : > { %1773 = vmatmul.mubr.bf16.vlgmr.msra.gmra.mrb[16].mxu1 %v1658_v10 }
 0xb47   : > { %1782 = vmatprep.mubr.bf16.mxu1 %v2674_v1  ;;  %v1018_v1 = vpop.permute.xlu1 %1017 }
 0xb48   : > { %v1091_v51 = vadd.f32 %v3281_v56, %v1018_v1  ;;  %v1093_v59 = vadd.f32 %v3283_v57, %v1018_v1  ;;  %v1097_v56 = vadd.f32 %v3287_v60, %v1022_v42 }
 0xb4a   : > { %v1103_v24 = vadd.f32 %v1091_v51, %v3121_v22  ;;  %v1104_v4 = vadd.f32 %v1093_v59, %v3124_v26  ;;  %v1106_v22 = vadd.f32 %v1097_v56, %v3131_v36 }
 0xb4e   : > { %1783 = vmatmul.mubr.bf16.gmra.mrb[20].mxu1 %v1659_v8 }
 0xc19   : > { %v1774_v29 = vpop.f32.mrb[16].mxu1 }
 0xc1a   : > { %v1775_v18 = vadd.f32 1.0, %v1774_v29  ;;  %v1776_v32 = vpop.f32.mrb[17].mxu1 }
 0xc1b   : > { %v1777_v2 = vadd.f32 1.0, %v1776_v32  ;;  %v1778_v20 = vpop.f32.mrb[18].mxu1 }
 0xc1c   : > { %v1793_v47 = vmul.f32 %v1775_v18, %v1099_v16  ;;  %v1779_v46 = vadd.f32 1.0, %v1778_v20  ;;  %v1780_v54 = vpop.f32.mrb[19].mxu1 }
 0xc1d   : > { %v1794_v41 = vmul.f32 %v1777_v2, %v1100_v28  ;;  %v1781_v31 = vadd.f32 1.0, %v1780_v54 }
 0xc1e   : > { %1801 = vst [vmem:[%s3384_s16] sm:$0xff] %v1793_v47  ;;  %v1795_v55 = vmul.f32 %v1779_v46, %v1101_v19 }
 0xc1f   : > { %1802 = vst [vmem:[%s3384_s16 + $0x8] sm:$0xff] %v1794_v41  ;;  %v1796_v21 = vmul.f32 %v1781_v31, %v1102_v43 }
 0xc20   : > { %1803 = vst [vmem:[%s3384_s16 + $0x10] sm:$0xff] %v1795_v55 }
 0xc21   : > { %1804 = vst [vmem:[%s3384_s16 + $0x18] sm:$0xff] %v1796_v21  ;;  %v1784_v23 = vpop.f32.mrb[20].mxu1 }
 0xc22   : > { %v1785_v25 = vadd.f32 1.0, %v1784_v23  ;;  %v1786_v45 = vpop.f32.mrb[21].mxu1 }
 0xc23   : > { %v1787_v5 = vadd.f32 1.0, %v1786_v45  ;;  %v1788_v57 = vpop.f32.mrb[22].mxu1 }
 0xc24   : > { %v1797_v60 = vmul.f32 %v1785_v25, %v1103_v24  ;;  %v1789_v27 = vadd.f32 1.0, %v1788_v57  ;;  %v1790_v30 = vpop.f32.mrb[23].mxu1 }
 0xc25   : > { %v1798_v33 = vmul.f32 %v1787_v5, %v1104_v4  ;;  %v1791_v26 = vadd.f32 1.0, %v1790_v30 }
 0xc26   : > { %1805 = vst [vmem:[%s3384_s16 + $0x20] sm:$0xff] %v1797_v60  ;;  %v1799_v12 = vmul.f32 %v1789_v27, %v1105_v58 }
 0xc27   : > { %1806 = vst [vmem:[%s3384_s16 + $0x28] sm:$0xff] %v1798_v33  ;;  %v1800_v35 = vmul.f32 %v1791_v26, %v1106_v22 }
 0xc28   : > { %1807 = vst [vmem:[%s3384_s16 + $0x30] sm:$0xff] %v1799_v12 }
 0xc29   : > { %1808 = vst [vmem:[%s3384_s16 + $0x38] sm:$0xff] %v1800_v35 }
 0xc2a   : > { %2599 = shalt.err (!%p2596_p13)
}
 0xc2b   : > { %s2600_s17 = scalar_lea.hbm %s3405_s12, 1024  ;;  %s2604_s14 = scalar_lea.hbm %s3460_s8, 2048 }
 0xc2c   : > { %p2601_p9 = scmp.ne.s32.totalorder %s3405_s12, %s2600_s17  ;;  %p2605_p4 = scmp.lt.u32.totalorder %s3405_s12, %s3460_s8 }
 0xc2d   : > { %p2606_p8 = scmp.lt.u32.totalorder %s2604_s14, %s2600_s17  ;;  %p2608_p10 = scmp.lt.u32.totalorder %s2600_s17, %s3405_s12 }
 0xc2e   : > { %p2602_p0 = pnand %p2601_p9, %p2912_p3 }
 0xc2f   : > { %p2607_p6 = por %p2606_p8, %p2605_p4 }
 0xc30   : > { %p2603_p11 = pneg %p2602_p0 }
 0xc31   : > { %p2609_p5 = por %p2608_p10, %p2607_p6 }
 0xc33   : > { %p2610_p7 = pnand %p2609_p5, %p2603_p11 }
 0xc35   : > { %2613 = shalt.err (!%p2610_p7)
}
 0xc36   : > { %s2694_s13 = smov 256   ;;  %s2695_s9 = smov 16  }
 0xc37   : > { %2183 = dma.vmem_to_hbm [thread:$0]  (%p2912_p3), %s3399_s22, 1024, %s3405_s12, %s1810_s18, %s2694_s13, %s2694_s13, %s2695_s9  }
 0xc38 PF: > { %s3482_s15 = sld [smem:[#allocation16_spill]]  ;;  %s3483_s19 = sld [smem:[#allocation17_spill]] }
 0xc39   : > { %p3485_p1 = scmp.ge.s32.totalorder %s2660_s30, 2 }
 0xc3e   : > { %s1838_s26 = sand.u32 1, %s3482_s15   ;;  %p3484_p12 = scmp.ne.s32.totalorder %s3483_s19, 0 }
 0xc3f   : > { %s1839_s21 = scalar_lea.sflag [#allocation4], %s1838_s26 }
 0xc40   : > { %p2203_p2 = pnand %p3485_p1, %p3484_p12 }
 0xc42   : > { %2643 = dma.done.wait (!%p2203_p2), %s1839_s21, 1024  }
 0xc43   : > { %2645 = vsyncadd (!%p2203_p2), %s1839_s21, 4294966272  ;;  %s3486_s17 = smov %s2899_s27  ;;  %p23_p13 = scmp.ge.s32.totalorder %s2899_s27, 4  }
 0xc44   : > { %s3487_s27 = smov %s2652_s28  ;;  %s3488_s28 = smov %s2656_s29 }
 0xc45   : > { %s3489_s29 = smov %s2908_s24  ;;  %s3490_s30 = smov %s3486_s17 }
 0xc46   :  { %25 = sbr.rel (!%p23_p13) target bundleno = 7 (0x7), region = 119 }
 0xc4d   :  { %1844 = vsyncpa [#allocation3], 1 }
 0xc4e   :  { %1846 = vsyncpa [#allocation3 + $0x1], 1 }
 0xc4f   :  { %1847 = vsyncpa [#allocation6], 1 }
 0xc50   :  { %1848 = vsyncpa [#allocation9], 1 }
 0xc51   :  { %1849 = vsyncpa [#allocation4], 1 }
 0xc52   :  { %1851 = vsyncpa [#allocation4 + $0x1], 1 }

</bundles_post_ra>
